<compile_context>
chip_gen: v6e
topology: v6e:2x2x1
jax: 0.10.0
libtpu: 0.0.40
codegen_flags: <defaults>
</compile_context>

<pallas_src>
import math

import jax
import jax.numpy as jnp
from jax.experimental import pallas as pl
from jax.experimental.pallas import tpu as pltpu

# ----- model hyper-parameters (small, consistent with the module) -----
LATENT_DIM = 32
N_HEADS = 4
HEAD_DIM = LATENT_DIM // N_HEADS
PF_DIM = 64
LN_EPS = 1e-5
NEG_INF = -1e10  # matches torch masked_fill value

PARAM_ORDER = ("wqkv_self", "wo_self", "wqkv_cross", "wo_cross",
               "w1", "w2", "bqkv", "b1", "vecs")


# ----------------------------- layout helpers ------------------------------
def _to_heads(z):
    """(R, D=H*Hd) -> (H*R, Hd): head-major rows (h, r). Lane slices + sublane concat."""
    return jnp.concatenate(
        [z[:, h * HEAD_DIM:(h + 1) * HEAD_DIM] for h in range(N_HEADS)], axis=0)


def _from_heads(z, rows):
    """(H*R, Hd) -> (R, D): heads concatenated along lanes (PyTorch contiguous order)."""
    return jnp.concatenate(
        [z[h * rows:(h + 1) * rows, :] for h in range(N_HEADS)], axis=-1)


# ------------------------------- kernel ------------------------------------
def _decoder_layer_kernel(x_ref, enc_ref, sbias_ref, cbias_ref,
                          wqkv_s_ref, wo_s_ref, wqkv_c_ref, wo_c_ref,
                          w1_ref, w2_ref, bqkv_ref, b1_ref, vecs_ref,
                          out_ref, attn_ref):
    """Whole DecoderLayer, whole batch, one grid step.
    x_ref  : (B*St, D)   target activations (batch folded into rows)
    enc_ref: (B*Ss, D)   encoder outputs
    sbias  : (H*B*St, H*B*St)  additive mask (0 / -1e10) for fused self-attention
    cbias  : (H*B*St, H*B*Ss)  additive mask for fused cross-attention
    out    : (B*St, D)
    attn   : (H*B*St, H*B*Ss)  fused cross-attention probabilities (block-diagonal)."""
    D = LATENT_DIM
    f32 = jnp.float32
    bf16 = jnp.bfloat16
    inv_scale = 1.0 / math.sqrt(HEAD_DIM)

    x0 = x_ref[...].astype(f32)      # (B*St, D)
    enc = enc_ref[...].astype(f32)   # (B*Ss, D)
    n_q = x0.shape[0]

    bqkv = bqkv_ref[...]             # (2, 3D): row 0 self, row 1 cross
    vecs = vecs_ref[...]             # (9, D) packed small vectors
    bo_s, bo_c, b2 = vecs[0:1, :], vecs[1:2, :], vecs[2:3, :]
    g1, be1 = vecs[3:4, :], vecs[4:5, :]
    g2, be2 = vecs[5:6, :], vecs[6:7, :]
    g3, be3 = vecs[7:8, :], vecs[8:9, :]

    def layer_norm(z, g, b):
        mu = jnp.mean(z, axis=-1, keepdims=True)
        var = jnp.mean((z - mu) ** 2, axis=-1, keepdims=True)
        return (z - mu) * jax.lax.rsqrt(var + LN_EPS) * g + b

    def attention(qh, kh, vh, bias):
        """qh:(H*Rq,Hd)  kh,vh:(H*Rk,Hd)  bias:(H*Rq,H*Rk). One dot for scores,
        one softmax over the fused key axis, one dot for the context."""
        s = jax.lax.dot_general(qh.astype(bf16), kh.astype(bf16),
                                (((1,), (1,)), ((), ())),
                                preferred_element_type=f32)
        s = s * inv_scale + bias
        s = s - jnp.max(s, axis=-1, keepdims=True)
        p = jnp.exp(s)                                   # cross-(b,h) entries -> 0 exactly
        a = p / jnp.sum(p, axis=-1, keepdims=True)       # exact; denom >= 1 always
        ctx = jnp.dot(a.astype(bf16), vh.astype(bf16), preferred_element_type=f32)
        return ctx, a

    # ---------------- self attention (fused QKV projection, fused heads) ----
    qkv = jnp.dot(x0.astype(bf16), wqkv_s_ref[...],
                  preferred_element_type=f32) + bqkv[0:1, :]          # (B*St, 3D)
    qh = _to_heads(qkv[:, :D])
    kh = _to_heads(qkv[:, D:2 * D])
    vh = _to_heads(qkv[:, 2 * D:])
    ctx_h, _ = attention(qh, kh, vh, sbias_ref[...])
    ctx = _from_heads(ctx_h, n_q)                                     # (B*St, D)
    sa = jnp.dot(ctx.astype(bf16), wo_s_ref[...], preferred_element_type=f32) + bo_s
    x1 = layer_norm(x0 + sa, g1, be1)            # self_attn_norm (dropout = identity)

    # ---------------- cross attention (query from x1, K/V from encoder) -----
    wqkv_c = wqkv_c_ref[...]
    q_c = jnp.dot(x1.astype(bf16), wqkv_c[:, :D],
                  preferred_element_type=f32) + bqkv[1:2, :D]
    kv_c = jnp.dot(enc.astype(bf16), wqkv_c[:, D:],
                   preferred_element_type=f32) + bqkv[1:2, D:]
    qh = _to_heads(q_c)
    kh = _to_heads(kv_c[:, :D])
    vh = _to_heads(kv_c[:, D:])
    ctx_h, a_cross = attention(qh, kh, vh, cbias_ref[...])
    ctx = _from_heads(ctx_h, n_q)
    ca = jnp.dot(ctx.astype(bf16), wo_c_ref[...], preferred_element_type=f32) + bo_c
    x2 = layer_norm(x1 + ca, g2, be2)            # enc_attn_norm

    # single slab store of the fused cross-attention probabilities
    attn_ref[...] = a_cross.astype(attn_ref.dtype)

    # ---------------- position-wise feed-forward + final norm ---------------
    h1 = jnp.maximum(jnp.dot(x2.astype(bf16), w1_ref[...],
                             preferred_element_type=f32) + b1_ref[...], 0.0)
    ff = jnp.dot(h1.astype(bf16), w2_ref[...], preferred_element_type=f32) + b2
    out_ref[...] = layer_norm(x2 + ff, g3, be3).astype(out_ref.dtype)   # pff_norm


# ------------------------------ wrapper -------------------------------------
def decoder_layer_forward(trg, enc_out, trg_mask, src_mask, params):
    """trg: (B,St,D); enc_out: (B,Ss,D); trg_mask: (B,1,St,St); src_mask: (B,1,1,Ss)
       (nonzero = attend). Returns (output (B,St,D), attention (B,H,St,Ss))."""
    B, St, D = trg.shape
    Ss = enc_out.shape[1]
    H = N_HEADS

    # Pre-bake additive -1e10 bias tensors for the fused (batch x head) attention.
    tmask = trg_mask.reshape(B, St, St) != 0
    smask = src_mask.reshape(B, Ss) != 0
    eye_h = jnp.eye(H, dtype=bool)
    eye_b = jnp.eye(B, dtype=bool)
    blk = eye_h[:, None, None, :, None, None] & eye_b[None, :, None, None, :, None]
    allowed_s = blk & tmask[None, :, :, None, None, :]                 # (H,B,St,H,B,St)
    allowed_c = jnp.broadcast_to(blk & smask[None, :, None, None, None, :],
                                 (H, B, St, H, B, Ss))
    zero = jnp.float32(0.0)
    ninf = jnp.float32(NEG_INF)
    sbias = jnp.where(allowed_s, zero, ninf).reshape(H * B * St, H * B * St)
    cbias = jnp.where(allowed_c, zero, ninf).reshape(H * B * St, H * B * Ss)

    x = trg.reshape(B * St, D).astype(jnp.float32)       # free contiguous reshape
    enc = enc_out.reshape(B * Ss, D).astype(jnp.float32)
    plist = [params[k] for k in PARAM_ORDER]

    def full_spec(p):  # whole-array block (single grid step)
        return pl.BlockSpec(p.shape, lambda i: (0,) * p.ndim)

    out_flat, p_full = pl.pallas_call(
        _decoder_layer_kernel,
        out_shape=(jax.ShapeDtypeStruct((B * St, D), jnp.float32),
                   jax.ShapeDtypeStruct((H * B * St, H * B * Ss), jnp.float32)),
        grid=(1,),
        in_specs=[full_spec(x), full_spec(enc), full_spec(sbias), full_spec(cbias)]
                + [full_spec(p) for p in plist],
        out_specs=(pl.BlockSpec((B * St, D), lambda i: (0, 0)),
                   pl.BlockSpec((H * B * St, H * B * Ss), lambda i: (0, 0))),
        compiler_params=pltpu.CompilerParams(dimension_semantics=("arbitrary",)),
    )(x, enc, sbias, cbias, *plist)

    out = out_flat.reshape(B, St, D)
    # Extract the (b, h) diagonal blocks of the fused attention matrix (layout plumbing).
    p6 = p_full.reshape(H, B, St, H, B, Ss)
    d1 = jnp.diagonal(p6, axis1=0, axis2=3)      # (B, St, B, Ss, H)
    d2 = jnp.diagonal(d1, axis1=0, axis2=2)      # (St, Ss, H, B)
    attn = jnp.transpose(d2, (3, 2, 0, 1))       # (B, H, St, Ss)
    return out, attn


# ------------------------ deterministic parameters --------------------------
def init_params(key):
    ks = iter(jax.random.split(key, 24))
    nk = lambda: next(ks)
    D, PF = LATENT_DIM, PF_DIM

    def lin(din, dout):  # weights stored transposed (in, out) so kernels compute x @ W + b
        w = 0.05 * jax.random.normal(nk(), (din, dout), jnp.float32)
        b = 0.05 * jax.random.normal(nk(), (1, dout), jnp.float32)
        return w, b

    wq_s, bq_s = lin(D, D); wk_s, bk_s = lin(D, D); wv_s, bv_s = lin(D, D); wo_s, bo_s = lin(D, D)
    wq_c, bq_c = lin(D, D); wk_c, bk_c = lin(D, D); wv_c, bv_c = lin(D, D); wo_c, bo_c = lin(D, D)
    w1, b1 = lin(D, PF); w2, b2 = lin(PF, D)
    ones = jnp.ones((1, D), jnp.float32)
    zeros = jnp.zeros((1, D), jnp.float32)

    wqkv_s = jnp.concatenate([wq_s, wk_s, wv_s], axis=1)            # (D, 3D)
    wqkv_c = jnp.concatenate([wq_c, wk_c, wv_c], axis=1)            # (D, 3D)
    bqkv = jnp.concatenate([jnp.concatenate([bq_s, bk_s, bv_s], axis=1),
                            jnp.concatenate([bq_c, bk_c, bv_c], axis=1)], axis=0)  # (2, 3D)
    # packed small vectors: [bo_self, bo_cross, b2, g/b self_norm, g/b enc_norm, g/b pff_norm]
    vecs = jnp.concatenate([bo_s, bo_c, b2, ones, zeros, ones, zeros, ones, zeros], axis=0)

    bf16 = jnp.bfloat16  # matmul weights stored bf16 (halves weight DMA; f32 accumulation)
    return dict(wqkv_self=wqkv_s.astype(bf16), wo_self=wo_s.astype(bf16),
                wqkv_cross=wqkv_c.astype(bf16), wo_cross=wo_c.astype(bf16),
                w1=w1.astype(bf16), w2=w2.astype(bf16),
                bqkv=bqkv, b1=b1, vecs=vecs)


# ----------------------- pure-JAX reference (checking) ----------------------
def _ref_mha(xq, xkv, wqkv, bqkv_row, wo, bo, mask):
    D = LATENT_DIM
    q = xq @ wqkv[:, :D] + bqkv_row[:, :D]
    k = xkv @ wqkv[:, D:2 * D] + bqkv_row[:, D:2 * D]
    v = xkv @ wqkv[:, 2 * D:] + bqkv_row[:, 2 * D:]
    B, Sq, _ = q.shape
    Sk = k.shape[1]
    qh = q.reshape(B, Sq, N_HEADS, HEAD_DIM).transpose(0, 2, 1, 3)
    kh = k.reshape(B, Sk, N_HEADS, HEAD_DIM).transpose(0, 2, 1, 3)
    vh = v.reshape(B, Sk, N_HEADS, HEAD_DIM).transpose(0, 2, 1, 3)
    e = jnp.einsum('bhqd,bhkd->bhqk', qh, kh) / math.sqrt(HEAD_DIM)
    e = jnp.where(mask != 0, e, NEG_INF)
    a = jax.nn.softmax(e, axis=-1)
    ctx = jnp.einsum('bhqk,bhkd->bhqd', a, vh).transpose(0, 2, 1, 3).reshape(B, Sq, D)
    return ctx @ wo + bo, a


def reference_forward(trg, enc_out, trg_mask, src_mask, params):
    f32 = jnp.float32
    wqkv_s, wo_s, wqkv_c, wo_c, w1, w2, bqkv, b1, vecs = (params[k] for k in PARAM_ORDER)
    wqkv_s, wo_s, wqkv_c, wo_c, w1, w2 = (
        w.astype(f32) for w in (wqkv_s, wo_s, wqkv_c, wo_c, w1, w2))
    bo_s, bo_c, b2 = vecs[0:1], vecs[1:2], vecs[2:3]
    g1, be1, g2, be2, g3, be3 = (vecs[i:i + 1] for i in range(3, 9))

    def ln(z, g, b):
        mu = z.mean(-1, keepdims=True)
        var = ((z - mu) ** 2).mean(-1, keepdims=True)
        return (z - mu) / jnp.sqrt(var + LN_EPS) * g + b

    sa, _ = _ref_mha(trg, trg, wqkv_s, bqkv[0:1], wo_s, bo_s, trg_mask)
    x = ln(trg + sa, g1, be1)
    ca, attn = _ref_mha(x, enc_out, wqkv_c, bqkv[1:2], wo_c, bo_c, src_mask)
    x = ln(x + ca, g2, be2)
    h1 = jnp.maximum(x @ w1 + b1, 0.0)
    ff = h1 @ w2 + b2
    return ln(x + ff, g3, be3), attn


# --------------------------------- main --------------------------------------
if __name__ == "__main__":
    key = jax.random.PRNGKey(0)
    k_trg, k_enc, k_par = jax.random.split(key, 3)

    B, St, Ss = 2, 8, 8
    trg = jax.random.normal(k_trg, (B, St, LATENT_DIM), jnp.float32)
    enc_out = jax.random.normal(k_enc, (B, Ss, LATENT_DIM), jnp.float32)

    # causal target mask; source mask with two trailing padding positions for batch 1
    causal = jnp.tril(jnp.ones((St, St), jnp.int32))
    trg_mask = jnp.broadcast_to(causal, (B, 1, St, St))
    src_mask = jnp.ones((B, 1, 1, Ss), jnp.int32).at[1, :, :, 6:].set(0)

    params = init_params(k_par)

    out, attn = decoder_layer_forward(trg, enc_out, trg_mask, src_mask, params)
    out, attn = jax.block_until_ready((out, attn))

    assert out.shape == (B, St, LATENT_DIM), out.shape
    assert attn.shape == (B, N_HEADS, St, Ss), attn.shape
    assert bool(jnp.all(jnp.isfinite(out))) and bool(jnp.all(jnp.isfinite(attn)))

    ref_out, ref_attn = reference_forward(trg, enc_out, trg_mask, src_mask, params)
    assert jnp.allclose(out, ref_out, rtol=2e-2, atol=2e-2)
    assert jnp.allclose(attn, ref_attn, rtol=2e-2, atol=2e-2)

    print("KERNEL_OK")
</pallas_src>

<mosaic_0001>
module attributes {stable_mosaic.version = 11 : i64} {
  func.func @_decoder_layer_kernel(%arg0: i32, %arg1: memref<16x32xf32, #tpu.memory_space<vmem>>, %arg2: memref<16x32xf32, #tpu.memory_space<vmem>>, %arg3: memref<64x64xf32, #tpu.memory_space<vmem>>, %arg4: memref<64x64xf32, #tpu.memory_space<vmem>>, %arg5: memref<32x96xbf16, #tpu.memory_space<vmem>>, %arg6: memref<32x32xbf16, #tpu.memory_space<vmem>>, %arg7: memref<32x96xbf16, #tpu.memory_space<vmem>>, %arg8: memref<32x32xbf16, #tpu.memory_space<vmem>>, %arg9: memref<32x64xbf16, #tpu.memory_space<vmem>>, %arg10: memref<64x32xbf16, #tpu.memory_space<vmem>>, %arg11: memref<2x96xf32, #tpu.memory_space<vmem>>, %arg12: memref<1x64xf32, #tpu.memory_space<vmem>>, %arg13: memref<9x32xf32, #tpu.memory_space<vmem>>, %arg14: memref<16x32xf32, #tpu.memory_space<vmem>>, %arg15: memref<64x64xf32, #tpu.memory_space<vmem>>) attributes {dimension_semantics = [#tpu.dimension_semantics<arbitrary>], iteration_bounds = array<i64: 1>, scalar_prefetch = 0 : i64, scratch_operands = 0 : i64, tpu.core_type = #tpu.core_type<tc>, window_params = [{pipeline_mode = #tpu.pipeline_mode<synchronous>, transform_indices = @transform_0, window_bounds = array<i64: 16, 32>}, {pipeline_mode = #tpu.pipeline_mode<synchronous>, transform_indices = @transform_1, window_bounds = array<i64: 16, 32>}, {pipeline_mode = #tpu.pipeline_mode<synchronous>, transform_indices = @transform_2, window_bounds = array<i64: 64, 64>}, {pipeline_mode = #tpu.pipeline_mode<synchronous>, transform_indices = @transform_3, window_bounds = array<i64: 64, 64>}, {pipeline_mode = #tpu.pipeline_mode<synchronous>, transform_indices = @transform_4, window_bounds = array<i64: 32, 96>}, {pipeline_mode = #tpu.pipeline_mode<synchronous>, transform_indices = @transform_5, window_bounds = array<i64: 32, 32>}, {pipeline_mode = #tpu.pipeline_mode<synchronous>, transform_indices = @transform_6, window_bounds = array<i64: 32, 96>}, {pipeline_mode = #tpu.pipeline_mode<synchronous>, transform_indices = @transform_7, window_bounds = array<i64: 32, 32>}, {pipeline_mode = #tpu.pipeline_mode<synchronous>, transform_indices = @transform_8, window_bounds = array<i64: 32, 64>}, {pipeline_mode = #tpu.pipeline_mode<synchronous>, transform_indices = @transform_9, window_bounds = array<i64: 64, 32>}, {pipeline_mode = #tpu.pipeline_mode<synchronous>, transform_indices = @transform_10, window_bounds = array<i64: 2, 96>}, {pipeline_mode = #tpu.pipeline_mode<synchronous>, transform_indices = @transform_11, window_bounds = array<i64: 1, 64>}, {pipeline_mode = #tpu.pipeline_mode<synchronous>, transform_indices = @transform_12, window_bounds = array<i64: 9, 32>}, {pipeline_mode = #tpu.pipeline_mode<synchronous>, transform_indices = @transform_13, window_bounds = array<i64: 16, 32>}, {pipeline_mode = #tpu.pipeline_mode<synchronous>, transform_indices = @transform_14, window_bounds = array<i64: 64, 64>}]} {
    %c0 = arith.constant 0 : index
    %c0_0 = arith.constant 0 : index
    %0 = vector.load %arg1[%c0, %c0_0] : memref<16x32xf32, #tpu.memory_space<vmem>>, vector<16x32xf32>
    %c0_1 = arith.constant 0 : index
    %c0_2 = arith.constant 0 : index
    %1 = vector.load %arg2[%c0_1, %c0_2] : memref<16x32xf32, #tpu.memory_space<vmem>>, vector<16x32xf32>
    %c0_3 = arith.constant 0 : index
    %c0_4 = arith.constant 0 : index
    %2 = vector.load %arg11[%c0_3, %c0_4] : memref<2x96xf32, #tpu.memory_space<vmem>>, vector<2x96xf32>
    %c0_5 = arith.constant 0 : index
    %c0_6 = arith.constant 0 : index
    %3 = vector.load %arg13[%c0_5, %c0_6] : memref<9x32xf32, #tpu.memory_space<vmem>>, vector<9x32xf32>
    %4 = vector.extract_strided_slice %3 {offsets = [0, 0], sizes = [1, 32], strides = [1, 1]} : vector<9x32xf32> to vector<1x32xf32>
    %5 = vector.extract_strided_slice %3 {offsets = [1, 0], sizes = [1, 32], strides = [1, 1]} : vector<9x32xf32> to vector<1x32xf32>
    %6 = vector.extract_strided_slice %3 {offsets = [2, 0], sizes = [1, 32], strides = [1, 1]} : vector<9x32xf32> to vector<1x32xf32>
    %7 = vector.extract_strided_slice %3 {offsets = [3, 0], sizes = [1, 32], strides = [1, 1]} : vector<9x32xf32> to vector<1x32xf32>
    %8 = vector.extract_strided_slice %3 {offsets = [4, 0], sizes = [1, 32], strides = [1, 1]} : vector<9x32xf32> to vector<1x32xf32>
    %9 = vector.extract_strided_slice %3 {offsets = [5, 0], sizes = [1, 32], strides = [1, 1]} : vector<9x32xf32> to vector<1x32xf32>
    %10 = vector.extract_strided_slice %3 {offsets = [6, 0], sizes = [1, 32], strides = [1, 1]} : vector<9x32xf32> to vector<1x32xf32>
    %11 = vector.extract_strided_slice %3 {offsets = [7, 0], sizes = [1, 32], strides = [1, 1]} : vector<9x32xf32> to vector<1x32xf32>
    %12 = vector.extract_strided_slice %3 {offsets = [8, 0], sizes = [1, 32], strides = [1, 1]} : vector<9x32xf32> to vector<1x32xf32>
    %13 = arith.truncf %0 : vector<16x32xf32> to vector<16x32xbf16>
    %c0_7 = arith.constant 0 : index
    %c0_8 = arith.constant 0 : index
    %14 = vector.load %arg5[%c0_7, %c0_8] : memref<32x96xbf16, #tpu.memory_space<vmem>>, vector<32x96xbf16>
    %cst = arith.constant dense<0.000000e+00> : vector<16x96xf32>
    %15 = tpu.matmul %13, %14, %cst {dimension_numbers = #tpu.dot_dimension_numbers<[1], [0], [0], [1], [0, 0, 1, 1], [], []>} : vector<16x32xbf16>, vector<32x96xbf16>, vector<16x96xf32> -> vector<16x96xf32>
    %16 = vector.extract_strided_slice %2 {offsets = [0, 0], sizes = [1, 96], strides = [1, 1]} : vector<2x96xf32> to vector<1x96xf32>
    %17 = vector.broadcast %16 : vector<1x96xf32> to vector<16x96xf32>
    %18 = arith.addf %15, %17 : vector<16x96xf32>
    %19 = vector.extract_strided_slice %18 {offsets = [0, 0], sizes = [16, 32], strides = [1, 1]} : vector<16x96xf32> to vector<16x32xf32>
    %20 = vector.extract_strided_slice %19 {offsets = [0, 0], sizes = [16, 8], strides = [1, 1]} : vector<16x32xf32> to vector<16x8xf32>
    %21 = vector.extract_strided_slice %19 {offsets = [0, 8], sizes = [16, 8], strides = [1, 1]} : vector<16x32xf32> to vector<16x8xf32>
    %22 = vector.extract_strided_slice %19 {offsets = [0, 16], sizes = [16, 8], strides = [1, 1]} : vector<16x32xf32> to vector<16x8xf32>
    %23 = vector.extract_strided_slice %19 {offsets = [0, 24], sizes = [16, 8], strides = [1, 1]} : vector<16x32xf32> to vector<16x8xf32>
    %24 = tpu.concatenate %20, %21, %22, %23 in 0 : vector<16x8xf32>, vector<16x8xf32>, vector<16x8xf32>, vector<16x8xf32> -> vector<64x8xf32>
    %25 = vector.extract_strided_slice %18 {offsets = [0, 32], sizes = [16, 32], strides = [1, 1]} : vector<16x96xf32> to vector<16x32xf32>
    %26 = vector.extract_strided_slice %25 {offsets = [0, 0], sizes = [16, 8], strides = [1, 1]} : vector<16x32xf32> to vector<16x8xf32>
    %27 = vector.extract_strided_slice %25 {offsets = [0, 8], sizes = [16, 8], strides = [1, 1]} : vector<16x32xf32> to vector<16x8xf32>
    %28 = vector.extract_strided_slice %25 {offsets = [0, 16], sizes = [16, 8], strides = [1, 1]} : vector<16x32xf32> to vector<16x8xf32>
    %29 = vector.extract_strided_slice %25 {offsets = [0, 24], sizes = [16, 8], strides = [1, 1]} : vector<16x32xf32> to vector<16x8xf32>
    %30 = tpu.concatenate %26, %27, %28, %29 in 0 : vector<16x8xf32>, vector<16x8xf32>, vector<16x8xf32>, vector<16x8xf32> -> vector<64x8xf32>
    %31 = vector.extract_strided_slice %18 {offsets = [0, 64], sizes = [16, 32], strides = [1, 1]} : vector<16x96xf32> to vector<16x32xf32>
    %32 = vector.extract_strided_slice %31 {offsets = [0, 0], sizes = [16, 8], strides = [1, 1]} : vector<16x32xf32> to vector<16x8xf32>
    %33 = vector.extract_strided_slice %31 {offsets = [0, 8], sizes = [16, 8], strides = [1, 1]} : vector<16x32xf32> to vector<16x8xf32>
    %34 = vector.extract_strided_slice %31 {offsets = [0, 16], sizes = [16, 8], strides = [1, 1]} : vector<16x32xf32> to vector<16x8xf32>
    %35 = vector.extract_strided_slice %31 {offsets = [0, 24], sizes = [16, 8], strides = [1, 1]} : vector<16x32xf32> to vector<16x8xf32>
    %36 = tpu.concatenate %32, %33, %34, %35 in 0 : vector<16x8xf32>, vector<16x8xf32>, vector<16x8xf32>, vector<16x8xf32> -> vector<64x8xf32>
    %c0_9 = arith.constant 0 : index
    %c0_10 = arith.constant 0 : index
    %37 = vector.load %arg3[%c0_9, %c0_10] : memref<64x64xf32, #tpu.memory_space<vmem>>, vector<64x64xf32>
    %38 = arith.truncf %24 : vector<64x8xf32> to vector<64x8xbf16>
    %39 = arith.truncf %30 : vector<64x8xf32> to vector<64x8xbf16>
    %cst_11 = arith.constant dense<0.000000e+00> : vector<64x64xf32>
    %40 = tpu.matmul %38, %39, %cst_11 {dimension_numbers = #tpu.dot_dimension_numbers<[1], [1], [0], [0], [0, 0, 1, 0], [], []>} : vector<64x8xbf16>, vector<64x8xbf16>, vector<64x64xf32> -> vector<64x64xf32>
    %cst_12 = arith.constant 0.353553385 : f32
    %41 = vector.broadcast %cst_12 : f32 to vector<64x64xf32>
    %42 = arith.mulf %40, %41 : vector<64x64xf32>
    %43 = arith.addf %42, %37 : vector<64x64xf32>
    %cst_13 = arith.constant dense<0xFF800000> : vector<64xf32>
    %44 = vector.multi_reduction <maximumf>, %43, %cst_13 [1] : vector<64x64xf32> to vector<64xf32>
    %45 = vector.shape_cast %44 : vector<64xf32> to vector<64x1xf32>
    %46 = vector.broadcast %45 : vector<64x1xf32> to vector<64x64xf32>
    %47 = arith.subf %43, %46 : vector<64x64xf32>
    %48 = math.exp %47 : vector<64x64xf32>
    %cst_14 = arith.constant dense<0.000000e+00> : vector<64xf32>
    %49 = vector.multi_reduction <add>, %48, %cst_14 [1] : vector<64x64xf32> to vector<64xf32>
    %50 = vector.shape_cast %49 : vector<64xf32> to vector<64x1xf32>
    %51 = vector.broadcast %50 : vector<64x1xf32> to vector<64x64xf32>
    %52 = arith.divf %48, %51 : vector<64x64xf32>
    %53 = arith.truncf %52 : vector<64x64xf32> to vector<64x64xbf16>
    %54 = arith.truncf %36 : vector<64x8xf32> to vector<64x8xbf16>
    %cst_15 = arith.constant dense<0.000000e+00> : vector<64x8xf32>
    %55 = tpu.matmul %53, %54, %cst_15 {dimension_numbers = #tpu.dot_dimension_numbers<[1], [0], [0], [1], [0, 0, 1, 1], [], []>} : vector<64x64xbf16>, vector<64x8xbf16>, vector<64x8xf32> -> vector<64x8xf32>
    %56 = vector.extract_strided_slice %55 {offsets = [0, 0], sizes = [16, 8], strides = [1, 1]} : vector<64x8xf32> to vector<16x8xf32>
    %57 = vector.extract_strided_slice %55 {offsets = [16, 0], sizes = [16, 8], strides = [1, 1]} : vector<64x8xf32> to vector<16x8xf32>
    %58 = vector.extract_strided_slice %55 {offsets = [32, 0], sizes = [16, 8], strides = [1, 1]} : vector<64x8xf32> to vector<16x8xf32>
    %59 = vector.extract_strided_slice %55 {offsets = [48, 0], sizes = [16, 8], strides = [1, 1]} : vector<64x8xf32> to vector<16x8xf32>
    %60 = tpu.concatenate %56, %57, %58, %59 in 1 : vector<16x8xf32>, vector<16x8xf32>, vector<16x8xf32>, vector<16x8xf32> -> vector<16x32xf32>
    %61 = arith.truncf %60 : vector<16x32xf32> to vector<16x32xbf16>
    %c0_16 = arith.constant 0 : index
    %c0_17 = arith.constant 0 : index
    %62 = vector.load %arg6[%c0_16, %c0_17] : memref<32x32xbf16, #tpu.memory_space<vmem>>, vector<32x32xbf16>
    %cst_18 = arith.constant dense<0.000000e+00> : vector<16x32xf32>
    %63 = tpu.matmul %61, %62, %cst_18 {dimension_numbers = #tpu.dot_dimension_numbers<[1], [0], [0], [1], [0, 0, 1, 1], [], []>} : vector<16x32xbf16>, vector<32x32xbf16>, vector<16x32xf32> -> vector<16x32xf32>
    %64 = vector.broadcast %4 : vector<1x32xf32> to vector<16x32xf32>
    %65 = arith.addf %63, %64 : vector<16x32xf32>
    %66 = arith.addf %0, %65 : vector<16x32xf32>
    %cst_19 = arith.constant dense<0.000000e+00> : vector<16xf32>
    %67 = vector.multi_reduction <add>, %66, %cst_19 [1] : vector<16x32xf32> to vector<16xf32>
    %68 = vector.shape_cast %67 : vector<16xf32> to vector<16x1xf32>
    %cst_20 = arith.constant 3.200000e+01 : f32
    %69 = vector.broadcast %cst_20 : f32 to vector<16x1xf32>
    %70 = arith.divf %68, %69 : vector<16x1xf32>
    %71 = vector.broadcast %70 : vector<16x1xf32> to vector<16x32xf32>
    %72 = arith.subf %66, %71 : vector<16x32xf32>
    %73 = arith.mulf %72, %72 : vector<16x32xf32>
    %cst_21 = arith.constant dense<0.000000e+00> : vector<16xf32>
    %74 = vector.multi_reduction <add>, %73, %cst_21 [1] : vector<16x32xf32> to vector<16xf32>
    %75 = vector.shape_cast %74 : vector<16xf32> to vector<16x1xf32>
    %cst_22 = arith.constant 3.200000e+01 : f32
    %76 = vector.broadcast %cst_22 : f32 to vector<16x1xf32>
    %77 = arith.divf %75, %76 : vector<16x1xf32>
    %78 = vector.broadcast %70 : vector<16x1xf32> to vector<16x32xf32>
    %79 = arith.subf %66, %78 : vector<16x32xf32>
    %cst_23 = arith.constant 9.99999974E-6 : f32
    %80 = vector.broadcast %cst_23 : f32 to vector<16x1xf32>
    %81 = arith.addf %77, %80 : vector<16x1xf32>
    %82 = math.rsqrt %81 : vector<16x1xf32>
    %83 = vector.broadcast %82 : vector<16x1xf32> to vector<16x32xf32>
    %84 = arith.mulf %79, %83 : vector<16x32xf32>
    %85 = vector.broadcast %7 : vector<1x32xf32> to vector<16x32xf32>
    %86 = arith.mulf %84, %85 : vector<16x32xf32>
    %87 = vector.broadcast %8 : vector<1x32xf32> to vector<16x32xf32>
    %88 = arith.addf %86, %87 : vector<16x32xf32>
    %c0_24 = arith.constant 0 : index
    %c0_25 = arith.constant 0 : index
    %89 = vector.load %arg7[%c0_24, %c0_25] : memref<32x96xbf16, #tpu.memory_space<vmem>>, vector<32x96xbf16>
    %90 = arith.truncf %88 : vector<16x32xf32> to vector<16x32xbf16>
    %91 = vector.extract_strided_slice %89 {offsets = [0, 0], sizes = [32, 32], strides = [1, 1]} : vector<32x96xbf16> to vector<32x32xbf16>
    %cst_26 = arith.constant dense<0.000000e+00> : vector<16x32xf32>
    %92 = tpu.matmul %90, %91, %cst_26 {dimension_numbers = #tpu.dot_dimension_numbers<[1], [0], [0], [1], [0, 0, 1, 1], [], []>} : vector<16x32xbf16>, vector<32x32xbf16>, vector<16x32xf32> -> vector<16x32xf32>
    %93 = vector.extract_strided_slice %2 {offsets = [1, 0], sizes = [1, 32], strides = [1, 1]} : vector<2x96xf32> to vector<1x32xf32>
    %94 = vector.broadcast %93 : vector<1x32xf32> to vector<16x32xf32>
    %95 = arith.addf %92, %94 : vector<16x32xf32>
    %96 = arith.truncf %1 : vector<16x32xf32> to vector<16x32xbf16>
    %97 = vector.extract_strided_slice %89 {offsets = [0, 32], sizes = [32, 64], strides = [1, 1]} : vector<32x96xbf16> to vector<32x64xbf16>
    %cst_27 = arith.constant dense<0.000000e+00> : vector<16x64xf32>
    %98 = tpu.matmul %96, %97, %cst_27 {dimension_numbers = #tpu.dot_dimension_numbers<[1], [0], [0], [1], [0, 0, 1, 1], [], []>} : vector<16x32xbf16>, vector<32x64xbf16>, vector<16x64xf32> -> vector<16x64xf32>
    %99 = vector.extract_strided_slice %2 {offsets = [1, 32], sizes = [1, 64], strides = [1, 1]} : vector<2x96xf32> to vector<1x64xf32>
    %100 = vector.broadcast %99 : vector<1x64xf32> to vector<16x64xf32>
    %101 = arith.addf %98, %100 : vector<16x64xf32>
    %102 = vector.extract_strided_slice %95 {offsets = [0, 0], sizes = [16, 8], strides = [1, 1]} : vector<16x32xf32> to vector<16x8xf32>
    %103 = vector.extract_strided_slice %95 {offsets = [0, 8], sizes = [16, 8], strides = [1, 1]} : vector<16x32xf32> to vector<16x8xf32>
    %104 = vector.extract_strided_slice %95 {offsets = [0, 16], sizes = [16, 8], strides = [1, 1]} : vector<16x32xf32> to vector<16x8xf32>
    %105 = vector.extract_strided_slice %95 {offsets = [0, 24], sizes = [16, 8], strides = [1, 1]} : vector<16x32xf32> to vector<16x8xf32>
    %106 = tpu.concatenate %102, %103, %104, %105 in 0 : vector<16x8xf32>, vector<16x8xf32>, vector<16x8xf32>, vector<16x8xf32> -> vector<64x8xf32>
    %107 = vector.extract_strided_slice %101 {offsets = [0, 0], sizes = [16, 32], strides = [1, 1]} : vector<16x64xf32> to vector<16x32xf32>
    %108 = vector.extract_strided_slice %107 {offsets = [0, 0], sizes = [16, 8], strides = [1, 1]} : vector<16x32xf32> to vector<16x8xf32>
    %109 = vector.extract_strided_slice %107 {offsets = [0, 8], sizes = [16, 8], strides = [1, 1]} : vector<16x32xf32> to vector<16x8xf32>
    %110 = vector.extract_strided_slice %107 {offsets = [0, 16], sizes = [16, 8], strides = [1, 1]} : vector<16x32xf32> to vector<16x8xf32>
    %111 = vector.extract_strided_slice %107 {offsets = [0, 24], sizes = [16, 8], strides = [1, 1]} : vector<16x32xf32> to vector<16x8xf32>
    %112 = tpu.concatenate %108, %109, %110, %111 in 0 : vector<16x8xf32>, vector<16x8xf32>, vector<16x8xf32>, vector<16x8xf32> -> vector<64x8xf32>
    %113 = vector.extract_strided_slice %101 {offsets = [0, 32], sizes = [16, 32], strides = [1, 1]} : vector<16x64xf32> to vector<16x32xf32>
    %114 = vector.extract_strided_slice %113 {offsets = [0, 0], sizes = [16, 8], strides = [1, 1]} : vector<16x32xf32> to vector<16x8xf32>
    %115 = vector.extract_strided_slice %113 {offsets = [0, 8], sizes = [16, 8], strides = [1, 1]} : vector<16x32xf32> to vector<16x8xf32>
    %116 = vector.extract_strided_slice %113 {offsets = [0, 16], sizes = [16, 8], strides = [1, 1]} : vector<16x32xf32> to vector<16x8xf32>
    %117 = vector.extract_strided_slice %113 {offsets = [0, 24], sizes = [16, 8], strides = [1, 1]} : vector<16x32xf32> to vector<16x8xf32>
    %118 = tpu.concatenate %114, %115, %116, %117 in 0 : vector<16x8xf32>, vector<16x8xf32>, vector<16x8xf32>, vector<16x8xf32> -> vector<64x8xf32>
    %c0_28 = arith.constant 0 : index
    %c0_29 = arith.constant 0 : index
    %119 = vector.load %arg4[%c0_28, %c0_29] : memref<64x64xf32, #tpu.memory_space<vmem>>, vector<64x64xf32>
    %120 = arith.truncf %106 : vector<64x8xf32> to vector<64x8xbf16>
    %121 = arith.truncf %112 : vector<64x8xf32> to vector<64x8xbf16>
    %cst_30 = arith.constant dense<0.000000e+00> : vector<64x64xf32>
    %122 = tpu.matmul %120, %121, %cst_30 {dimension_numbers = #tpu.dot_dimension_numbers<[1], [1], [0], [0], [0, 0, 1, 0], [], []>} : vector<64x8xbf16>, vector<64x8xbf16>, vector<64x64xf32> -> vector<64x64xf32>
    %cst_31 = arith.constant 0.353553385 : f32
    %123 = vector.broadcast %cst_31 : f32 to vector<64x64xf32>
    %124 = arith.mulf %122, %123 : vector<64x64xf32>
    %125 = arith.addf %124, %119 : vector<64x64xf32>
    %cst_32 = arith.constant dense<0xFF800000> : vector<64xf32>
    %126 = vector.multi_reduction <maximumf>, %125, %cst_32 [1] : vector<64x64xf32> to vector<64xf32>
    %127 = vector.shape_cast %126 : vector<64xf32> to vector<64x1xf32>
    %128 = vector.broadcast %127 : vector<64x1xf32> to vector<64x64xf32>
    %129 = arith.subf %125, %128 : vector<64x64xf32>
    %130 = math.exp %129 : vector<64x64xf32>
    %cst_33 = arith.constant dense<0.000000e+00> : vector<64xf32>
    %131 = vector.multi_reduction <add>, %130, %cst_33 [1] : vector<64x64xf32> to vector<64xf32>
    %132 = vector.shape_cast %131 : vector<64xf32> to vector<64x1xf32>
    %133 = vector.broadcast %132 : vector<64x1xf32> to vector<64x64xf32>
    %134 = arith.divf %130, %133 : vector<64x64xf32>
    %135 = arith.truncf %134 : vector<64x64xf32> to vector<64x64xbf16>
    %136 = arith.truncf %118 : vector<64x8xf32> to vector<64x8xbf16>
    %cst_34 = arith.constant dense<0.000000e+00> : vector<64x8xf32>
    %137 = tpu.matmul %135, %136, %cst_34 {dimension_numbers = #tpu.dot_dimension_numbers<[1], [0], [0], [1], [0, 0, 1, 1], [], []>} : vector<64x64xbf16>, vector<64x8xbf16>, vector<64x8xf32> -> vector<64x8xf32>
    %138 = vector.extract_strided_slice %137 {offsets = [0, 0], sizes = [16, 8], strides = [1, 1]} : vector<64x8xf32> to vector<16x8xf32>
    %139 = vector.extract_strided_slice %137 {offsets = [16, 0], sizes = [16, 8], strides = [1, 1]} : vector<64x8xf32> to vector<16x8xf32>
    %140 = vector.extract_strided_slice %137 {offsets = [32, 0], sizes = [16, 8], strides = [1, 1]} : vector<64x8xf32> to vector<16x8xf32>
    %141 = vector.extract_strided_slice %137 {offsets = [48, 0], sizes = [16, 8], strides = [1, 1]} : vector<64x8xf32> to vector<16x8xf32>
    %142 = tpu.concatenate %138, %139, %140, %141 in 1 : vector<16x8xf32>, vector<16x8xf32>, vector<16x8xf32>, vector<16x8xf32> -> vector<16x32xf32>
    %143 = arith.truncf %142 : vector<16x32xf32> to vector<16x32xbf16>
    %c0_35 = arith.constant 0 : index
    %c0_36 = arith.constant 0 : index
    %144 = vector.load %arg8[%c0_35, %c0_36] : memref<32x32xbf16, #tpu.memory_space<vmem>>, vector<32x32xbf16>
    %cst_37 = arith.constant dense<0.000000e+00> : vector<16x32xf32>
    %145 = tpu.matmul %143, %144, %cst_37 {dimension_numbers = #tpu.dot_dimension_numbers<[1], [0], [0], [1], [0, 0, 1, 1], [], []>} : vector<16x32xbf16>, vector<32x32xbf16>, vector<16x32xf32> -> vector<16x32xf32>
    %146 = vector.broadcast %5 : vector<1x32xf32> to vector<16x32xf32>
    %147 = arith.addf %145, %146 : vector<16x32xf32>
    %148 = arith.addf %88, %147 : vector<16x32xf32>
    %cst_38 = arith.constant dense<0.000000e+00> : vector<16xf32>
    %149 = vector.multi_reduction <add>, %148, %cst_38 [1] : vector<16x32xf32> to vector<16xf32>
    %150 = vector.shape_cast %149 : vector<16xf32> to vector<16x1xf32>
    %cst_39 = arith.constant 3.200000e+01 : f32
    %151 = vector.broadcast %cst_39 : f32 to vector<16x1xf32>
    %152 = arith.divf %150, %151 : vector<16x1xf32>
    %153 = vector.broadcast %152 : vector<16x1xf32> to vector<16x32xf32>
    %154 = arith.subf %148, %153 : vector<16x32xf32>
    %155 = arith.mulf %154, %154 : vector<16x32xf32>
    %cst_40 = arith.constant dense<0.000000e+00> : vector<16xf32>
    %156 = vector.multi_reduction <add>, %155, %cst_40 [1] : vector<16x32xf32> to vector<16xf32>
    %157 = vector.shape_cast %156 : vector<16xf32> to vector<16x1xf32>
    %cst_41 = arith.constant 3.200000e+01 : f32
    %158 = vector.broadcast %cst_41 : f32 to vector<16x1xf32>
    %159 = arith.divf %157, %158 : vector<16x1xf32>
    %160 = vector.broadcast %152 : vector<16x1xf32> to vector<16x32xf32>
    %161 = arith.subf %148, %160 : vector<16x32xf32>
    %cst_42 = arith.constant 9.99999974E-6 : f32
    %162 = vector.broadcast %cst_42 : f32 to vector<16x1xf32>
    %163 = arith.addf %159, %162 : vector<16x1xf32>
    %164 = math.rsqrt %163 : vector<16x1xf32>
    %165 = vector.broadcast %164 : vector<16x1xf32> to vector<16x32xf32>
    %166 = arith.mulf %161, %165 : vector<16x32xf32>
    %167 = vector.broadcast %9 : vector<1x32xf32> to vector<16x32xf32>
    %168 = arith.mulf %166, %167 : vector<16x32xf32>
    %169 = vector.broadcast %10 : vector<1x32xf32> to vector<16x32xf32>
    %170 = arith.addf %168, %169 : vector<16x32xf32>
    %c0_43 = arith.constant 0 : index
    %c0_44 = arith.constant 0 : index
    %171 = vector.load %arg15[%c0_43, %c0_44] : memref<64x64xf32, #tpu.memory_space<vmem>>, vector<64x64xf32>
    tpu.vector_store %arg15[%c0_43, %c0_44], %134 {strides = array<i32>} : memref<64x64xf32, #tpu.memory_space<vmem>>, vector<64x64xf32>,
    %172 = arith.truncf %170 : vector<16x32xf32> to vector<16x32xbf16>
    %c0_45 = arith.constant 0 : index
    %c0_46 = arith.constant 0 : index
    %173 = vector.load %arg9[%c0_45, %c0_46] : memref<32x64xbf16, #tpu.memory_space<vmem>>, vector<32x64xbf16>
    %cst_47 = arith.constant dense<0.000000e+00> : vector<16x64xf32>
    %174 = tpu.matmul %172, %173, %cst_47 {dimension_numbers = #tpu.dot_dimension_numbers<[1], [0], [0], [1], [0, 0, 1, 1], [], []>} : vector<16x32xbf16>, vector<32x64xbf16>, vector<16x64xf32> -> vector<16x64xf32>
    %c0_48 = arith.constant 0 : index
    %c0_49 = arith.constant 0 : index
    %175 = vector.load %arg12[%c0_48, %c0_49] : memref<1x64xf32, #tpu.memory_space<vmem>>, vector<1x64xf32>
    %176 = vector.broadcast %175 : vector<1x64xf32> to vector<16x64xf32>
    %177 = arith.addf %174, %176 : vector<16x64xf32>
    %cst_50 = arith.constant 0.000000e+00 : f32
    %178 = vector.broadcast %cst_50 : f32 to vector<16x64xf32>
    %179 = arith.maximumf %177, %178 : vector<16x64xf32>
    %180 = arith.truncf %179 : vector<16x64xf32> to vector<16x64xbf16>
    %c0_51 = arith.constant 0 : index
    %c0_52 = arith.constant 0 : index
    %181 = vector.load %arg10[%c0_51, %c0_52] : memref<64x32xbf16, #tpu.memory_space<vmem>>, vector<64x32xbf16>
    %cst_53 = arith.constant dense<0.000000e+00> : vector<16x32xf32>
    %182 = tpu.matmul %180, %181, %cst_53 {dimension_numbers = #tpu.dot_dimension_numbers<[1], [0], [0], [1], [0, 0, 1, 1], [], []>} : vector<16x64xbf16>, vector<64x32xbf16>, vector<16x32xf32> -> vector<16x32xf32>
    %183 = vector.broadcast %6 : vector<1x32xf32> to vector<16x32xf32>
    %184 = arith.addf %182, %183 : vector<16x32xf32>
    %185 = arith.addf %170, %184 : vector<16x32xf32>
    %cst_54 = arith.constant dense<0.000000e+00> : vector<16xf32>
    %186 = vector.multi_reduction <add>, %185, %cst_54 [1] : vector<16x32xf32> to vector<16xf32>
    %187 = vector.shape_cast %186 : vector<16xf32> to vector<16x1xf32>
    %cst_55 = arith.constant 3.200000e+01 : f32
    %188 = vector.broadcast %cst_55 : f32 to vector<16x1xf32>
    %189 = arith.divf %187, %188 : vector<16x1xf32>
    %190 = vector.broadcast %189 : vector<16x1xf32> to vector<16x32xf32>
    %191 = arith.subf %185, %190 : vector<16x32xf32>
    %192 = arith.mulf %191, %191 : vector<16x32xf32>
    %cst_56 = arith.constant dense<0.000000e+00> : vector<16xf32>
    %193 = vector.multi_reduction <add>, %192, %cst_56 [1] : vector<16x32xf32> to vector<16xf32>
    %194 = vector.shape_cast %193 : vector<16xf32> to vector<16x1xf32>
    %cst_57 = arith.constant 3.200000e+01 : f32
    %195 = vector.broadcast %cst_57 : f32 to vector<16x1xf32>
    %196 = arith.divf %194, %195 : vector<16x1xf32>
    %197 = vector.broadcast %189 : vector<16x1xf32> to vector<16x32xf32>
    %198 = arith.subf %185, %197 : vector<16x32xf32>
    %cst_58 = arith.constant 9.99999974E-6 : f32
    %199 = vector.broadcast %cst_58 : f32 to vector<16x1xf32>
    %200 = arith.addf %196, %199 : vector<16x1xf32>
    %201 = math.rsqrt %200 : vector<16x1xf32>
    %202 = vector.broadcast %201 : vector<16x1xf32> to vector<16x32xf32>
    %203 = arith.mulf %198, %202 : vector<16x32xf32>
    %204 = vector.broadcast %11 : vector<1x32xf32> to vector<16x32xf32>
    %205 = arith.mulf %203, %204 : vector<16x32xf32>
    %206 = vector.broadcast %12 : vector<1x32xf32> to vector<16x32xf32>
    %207 = arith.addf %205, %206 : vector<16x32xf32>
    %c0_59 = arith.constant 0 : index
    %c0_60 = arith.constant 0 : index
    %208 = vector.load %arg14[%c0_59, %c0_60] : memref<16x32xf32, #tpu.memory_space<vmem>>, vector<16x32xf32>
    tpu.vector_store %arg14[%c0_59, %c0_60], %207 {strides = array<i32>} : memref<16x32xf32, #tpu.memory_space<vmem>>, vector<16x32xf32>,
    return
  }
  func.func @transform_0(%arg0: i32) -> (i32, i32) {
    %c0_i32 = arith.constant 0 : i32
    %c0_i32_0 = arith.constant 0 : i32
    %c0_i32_1 = arith.constant 0 : i32
    return %c0_i32, %c0_i32_0 : i32, i32
  }
  func.func @transform_1(%arg0: i32) -> (i32, i32) {
    %c0_i32 = arith.constant 0 : i32
    %c0_i32_0 = arith.constant 0 : i32
    %c0_i32_1 = arith.constant 0 : i32
    return %c0_i32, %c0_i32_0 : i32, i32
  }
  func.func @transform_2(%arg0: i32) -> (i32, i32) {
    %c0_i32 = arith.constant 0 : i32
    %c0_i32_0 = arith.constant 0 : i32
    %c0_i32_1 = arith.constant 0 : i32
    return %c0_i32, %c0_i32_0 : i32, i32
  }
  func.func @transform_3(%arg0: i32) -> (i32, i32) {
    %c0_i32 = arith.constant 0 : i32
    %c0_i32_0 = arith.constant 0 : i32
    %c0_i32_1 = arith.constant 0 : i32
    return %c0_i32, %c0_i32_0 : i32, i32
  }
  func.func @transform_4(%arg0: i32) -> (i32, i32) {
    %c0_i32 = arith.constant 0 : i32
    %c0_i32_0 = arith.constant 0 : i32
    %c0_i32_1 = arith.constant 0 : i32
    return %c0_i32, %c0_i32_0 : i32, i32
  }
  func.func @transform_5(%arg0: i32) -> (i32, i32) {
    %c0_i32 = arith.constant 0 : i32
    %c0_i32_0 = arith.constant 0 : i32
    %c0_i32_1 = arith.constant 0 : i32
    return %c0_i32, %c0_i32_0 : i32, i32
  }
  func.func @transform_6(%arg0: i32) -> (i32, i32) {
    %c0_i32 = arith.constant 0 : i32
    %c0_i32_0 = arith.constant 0 : i32
    %c0_i32_1 = arith.constant 0 : i32
    return %c0_i32, %c0_i32_0 : i32, i32
  }
  func.func @transform_7(%arg0: i32) -> (i32, i32) {
    %c0_i32 = arith.constant 0 : i32
    %c0_i32_0 = arith.constant 0 : i32
    %c0_i32_1 = arith.constant 0 : i32
    return %c0_i32, %c0_i32_0 : i32, i32
  }
  func.func @transform_8(%arg0: i32) -> (i32, i32) {
    %c0_i32 = arith.constant 0 : i32
    %c0_i32_0 = arith.constant 0 : i32
    %c0_i32_1 = arith.constant 0 : i32
    return %c0_i32, %c0_i32_0 : i32, i32
  }
  func.func @transform_9(%arg0: i32) -> (i32, i32) {
    %c0_i32 = arith.constant 0 : i32
    %c0_i32_0 = arith.constant 0 : i32
    %c0_i32_1 = arith.constant 0 : i32
    return %c0_i32, %c0_i32_0 : i32, i32
  }
  func.func @transform_10(%arg0: i32) -> (i32, i32) {
    %c0_i32 = arith.constant 0 : i32
    %c0_i32_0 = arith.constant 0 : i32
    %c0_i32_1 = arith.constant 0 : i32
    return %c0_i32, %c0_i32_0 : i32, i32
  }
  func.func @transform_11(%arg0: i32) -> (i32, i32) {
    %c0_i32 = arith.constant 0 : i32
    %c0_i32_0 = arith.constant 0 : i32
    %c0_i32_1 = arith.constant 0 : i32
    return %c0_i32, %c0_i32_0 : i32, i32
  }
  func.func @transform_12(%arg0: i32) -> (i32, i32) {
    %c0_i32 = arith.constant 0 : i32
    %c0_i32_0 = arith.constant 0 : i32
    %c0_i32_1 = arith.constant 0 : i32
    return %c0_i32, %c0_i32_0 : i32, i32
  }
  func.func @transform_13(%arg0: i32) -> (i32, i32) {
    %c0_i32 = arith.constant 0 : i32
    %c0_i32_0 = arith.constant 0 : i32
    %c0_i32_1 = arith.constant 0 : i32
    return %c0_i32, %c0_i32_0 : i32, i32
  }
  func.func @transform_14(%arg0: i32) -> (i32, i32) {
    %c0_i32 = arith.constant 0 : i32
    %c0_i32_0 = arith.constant 0 : i32
    %c0_i32_1 = arith.constant 0 : i32
    return %c0_i32, %c0_i32_0 : i32, i32
  }
}

</mosaic_0001>

<bundles_post_ra>
// kernel: tpu_custom_call.1
= control target key start
LH: loop header
LB: loop body
LE: loop exit
PB: predicated region body
PF: predicated region fallthrough
CT: control target
= control target key end

     0   :  { %20 = vsyncpa [#allocation3], 0  ;;  %s2533_s0 = inlined_call_operand.vmem [shape: f32[16,32], index: 0, kind: input, shape index: {}]   ;;  %s2534_s1 = inlined_call_operand.vmem [shape: f32[16,32], index: 1, kind: input, shape index: {}]   ;;  %s2535_s2 = inlined_call_operand.hbm [shape: f32[64,64], index: 2, kind: input, shape index: {}]   ;;  %s2536_s3 = inlined_call_operand.hbm [shape: f32[64,64], index: 3, kind: input, shape index: {}]   ;;  %s2537_s4 = inlined_call_operand.vmem [shape: bf16[32,96], index: 4, kind: input, shape index: {}]   ;;  %s2538_s5 = inlined_call_operand.hbm [shape: bf16[32,32], index: 5, kind: input, shape index: {}]   ;;  %s2539_s6 = inlined_call_operand.hbm [shape: bf16[32,96], index: 6, kind: input, shape index: {}]   ;;  %s2540_s7 = inlined_call_operand.hbm [shape: bf16[32,32], index: 7, kind: input, shape index: {}]   ;;  %s2541_s8 = inlined_call_operand.hbm [shape: bf16[32,64], index: 8, kind: input, shape index: {}]   ;;  %s2542_s9 = inlined_call_operand.vmem [shape: bf16[64,32], index: 9, kind: input, shape index: {}]   ;;  %s2543_s10 = inlined_call_operand.vmem [shape: f32[2,96], index: 10, kind: input, shape index: {}]   ;;  %s2544_s11 = inlined_call_operand.vmem [shape: f32[1,64], index: 11, kind: input, shape index: {}]   ;;  %s2545_s12 = inlined_call_operand.vmem [shape: f32[9,32], index: 12, kind: input, shape index: {}]   ;;  %s2546_s13 = inlined_call_operand.hbm [shape: f32[16,32], index: 13, kind: output, shape index: {0}]   ;;  %s2547_s14 = inlined_call_operand.hbm [shape: f32[64,64], index: 14, kind: output, shape index: {1}]  }
   0x1   :  { %21 = vsyncpa [#allocation6], 0 }
   0x2   :  { %22 = vsyncpa [#allocation9], 0 }
   0x3   :  { %23 = vsyncpa [#allocation12], 0 }
   0x4   :  { %24 = vsyncpa [#allocation4], 0 }
   0x5   :  { %25 = vsyncpa [#allocation15], 0  ;;  %s2095_s29 = smov [#allocation5]  }
   0x6   :  { %s47_s30 = sshll.u32 %s2095_s29, 4  ;;  %s48_s30 = int_to_ptr.vmem [resolvable:$true] %s47_s30 }
   0x7   :  { %s1931_s15 = scalar_lea.vmem %s48_s30, 1024  ;;  %p1936_p1 = scmp.lt.s32.totalorder %s48_s30, %s48_s30 }
   0x8   :  { %p1932_p0 = scmp.ne.s32.totalorder %s48_s30, %s1931_s15  ;;  %p1937_p2 = scmp.lt.s32.totalorder %s1931_s15, %s1931_s15 }
   0xa   :  { %p1938_p3 = por %p1937_p2, %p1936_p1 }
   0xc   :  { %p1939_p4 = pnand %p1938_p3, %p1932_p0 }
   0xe   :  { %1942 = shalt.err (!%p1939_p4)
}
   0xf   :  { %s2096_s16 = smov 128   ;;  %s2097_s17 = smov 8  }
  0x10   :  { %53 = dma.hbm_to_vmem [thread:$0]  %s2536_s3, 1024, %s48_s30, [#allocation6], %s2096_s16, %s2096_s16, %s2097_s17  }
  0x11   :  { %s2098_s20 = smov [#allocation8]   ;;  %s2099_s22 = smov [#allocation2]  }
  0x12   :  { %s73_s21 = sshll.u32 %s2098_s20, 4  ;;  %s35_s23 = sshll.u32 %s2099_s22, 4  ;;  %s74_s21 = int_to_ptr.vmem [resolvable:$true] %s73_s21  ;;  %s36_s23 = int_to_ptr.vmem [resolvable:$true] %s35_s23 }
  0x13   :  { %s1951_s24 = scalar_lea.vmem %s74_s21, 256  ;;  %p1956_p6 = scmp.lt.s32.totalorder %s74_s21, %s74_s21 }
  0x14   :  { %p1952_p5 = scmp.ne.s32.totalorder %s74_s21, %s1951_s24  ;;  %p1957_p7 = scmp.lt.s32.totalorder %s1951_s24, %s1951_s24 }
  0x16   :  { %p1958_p8 = por %p1957_p7, %p1956_p6 }
  0x18   :  { %p1959_p9 = pnand %p1958_p8, %p1952_p5 }
  0x1a   :  { %1962 = shalt.err (!%p1959_p9)
}
  0x1b   :  { %s2100_s25 = smov 64   ;;  %s2101_s26 = smov 4  }
  0x1c   :  { %79 = dma.hbm_to_vmem [thread:$0]  %s2539_s6, 256, %s74_s21, [#allocation9], %s2100_s25, %s2100_s25, %s2101_s26  }
  0x1d   :  { %s1971_s3 = scalar_lea.vmem %s36_s23, 1024  ;;  %p1976_p11 = scmp.lt.s32.totalorder %s36_s23, %s36_s23 }
  0x1e   :  { %p1972_p10 = scmp.ne.s32.totalorder %s36_s23, %s1971_s3  ;;  %p1977_p12 = scmp.lt.s32.totalorder %s1971_s3, %s1971_s3 }
  0x20   :  { %p1978_p13 = por %p1977_p12, %p1976_p11 }
  0x22   :  { %p1979_p0 = pnand %p1978_p13, %p1972_p10 }
  0x24   :  { %1982 = shalt.err (!%p1979_p0)
}
  0x25   :  { %41 = dma.hbm_to_vmem [thread:$0]  %s2535_s2, 1024, %s36_s23, [#allocation3], %s2096_s16, %s2096_s16, %s2097_s17  }
  0x26   :  { %s2102_s15 = smov [#allocation7]   ;;  %s2103_s19 = smov [#allocation10]  }
  0x27   :  { %s61_s18 = sshll.u32 %s2102_s15, 4  ;;  %s85_s6 = sshll.u32 %s2103_s19, 4  ;;  %s62_s18 = int_to_ptr.vmem [resolvable:$true] %s61_s18  ;;  %s86_s6 = int_to_ptr.vmem [resolvable:$true] %s85_s6 }
  0x28   :  { %s1991_s20 = scalar_lea.vmem %s62_s18, 256  ;;  %p1996_p2 = scmp.lt.s32.totalorder %s62_s18, %s62_s18 }
  0x29   :  { %p1992_p1 = scmp.ne.s32.totalorder %s62_s18, %s1991_s20  ;;  %p1997_p3 = scmp.lt.s32.totalorder %s1991_s20, %s1991_s20 }
  0x2b   :  { %p1998_p4 = por %p1997_p3, %p1996_p2 }
  0x2d   :  { %p1999_p5 = pnand %p1998_p4, %p1992_p1 }
  0x2f   :  { %2002 = shalt.err (!%p1999_p5)
}
  0x30   :  { %67 = dma.hbm_to_vmem [thread:$0]  %s2538_s5, 256, %s62_s18, [#allocation6], %s2100_s25, %s2100_s25, %s2101_s26  }
  0x31   :  { %s2011_s2 = scalar_lea.vmem %s86_s6, 256  ;;  %p2016_p7 = scmp.lt.s32.totalorder %s86_s6, %s86_s6 }
  0x32   :  { %p2012_p6 = scmp.ne.s32.totalorder %s86_s6, %s2011_s2  ;;  %p2017_p8 = scmp.lt.s32.totalorder %s2011_s2, %s2011_s2 }
  0x34   :  { %p2018_p9 = por %p2017_p8, %p2016_p7 }
  0x36   :  { %p2019_p10 = pnand %p2018_p9, %p2012_p6 }
  0x38   :  { %2022 = shalt.err (!%p2019_p10)
}
  0x39   :  { %91 = dma.hbm_to_vmem [thread:$0]  %s2540_s7, 256, %s86_s6, [#allocation9], %s2100_s25, %s2100_s25, %s2101_s26  }
  0x3a   :  { %s2104_s27 = smov [#allocation11]  }
  0x3b   :  { %s97_s28 = sshll.u32 %s2104_s27, 4  ;;  %s98_s28 = int_to_ptr.vmem [resolvable:$true] %s97_s28 }
  0x3c   :  { %s2031_s3 = scalar_lea.vmem %s98_s28, 256  ;;  %p2036_p12 = scmp.lt.s32.totalorder %s98_s28, %s98_s28 }
  0x3d   :  { %p2032_p11 = scmp.ne.s32.totalorder %s98_s28, %s2031_s3  ;;  %p2037_p13 = scmp.lt.s32.totalorder %s2031_s3, %s2031_s3 }
  0x3f   :  { %p2038_p0 = por %p2037_p13, %p2036_p12 }
  0x41   :  { %p2039_p1 = pnand %p2038_p0, %p2032_p11 }
  0x43   :  { %2042 = shalt.err (!%p2039_p1)
}
  0x44   :  { %103 = dma.hbm_to_vmem [thread:$0]  %s2541_s8, 256, %s98_s28, [#allocation12], %s2100_s25, %s2100_s25, %s2101_s26  }
  0x45   :  { %2083 = dma.done.wait [#allocation3], 1024  }
  0x46   :  { %2084 = vsyncadd [#allocation3], 4294966272 }
  0x47   :  { %2085 = dma.done.wait [#allocation6], 1280  }
  0x48   :  { %2086 = vsyncadd [#allocation6], 4294966016 }
  0x49   :  { %2087 = dma.done.wait [#allocation9], 512  }
  0x4a   :  { %2088 = vsyncadd [#allocation9], 4294966784 }
  0x4b   :  { %2089 = dma.done.wait [#allocation12], 256  }
  0x4c   :  { %2090 = vsyncadd [#allocation12], 4294967040  ;;  %v2105_v0 = vmov 0.0   ;;  %vm2106_vm0 = vmmov 0   ;;  %v1833_v1 = vld [vmem:[%s2537_s4 + $0x8] sm:$0xff]   ;;  %v1834_v2 = vld [vmem:[%s2537_s4] sm:$0xff]   ;;  %v143_v6 = vlaneseq }
  0x4d   :  { %1606 = vmatprep.subr.bf16.mxu0 %v2105_v0  ;;  %1610 = vmatprep.mubr.msk.bf16.mxu0 %vm2106_vm0, %v2105_v0  ;;  %v2238_v3 = vld [vmem:[%s2533_s0] sm:$0xff]  ;;  %v2243_v4 = vld [vmem:[%s2533_s0 + $0x8] sm:$0xff]  ;;  %vm159_vm1 = vcmask 261120   ;;  %vm248_vm2 = vcmask 64512   ;;  %s2107_s0 = smov 120   ;;  %s2108_s21 = smov 104  }
  0x4e   :  { %1607 = vmatpush3.bf16.msra.mxu0 %v1833_v1  ;;  %v138_v5 = vpack.c.bf16 %v2243_v4, %v2238_v3  ;;  %v2249_v7 = vshrl.u32 %v143_v6, 7  ;;  %v2255_v9 = vld [vmem:[%s2543_s10] sm:$0x3]  ;;  %s2109_s10 = smov 112   ;;  %s2110_s22 = smov 96   ;;  %v227_v44 = vld [vmem:[#allocation2 + $0x18] sm:$0xff] }
  0x4f   :  { %1608 = vmatprep.subr.bf16.mxu0 %v2105_v0  ;;  %v224_v41 = vld [vmem:[#allocation2] sm:$0xff]  ;;  %vm354_vm3 = vcmask 523264   ;;  %v225_v49 = vld [vmem:[#allocation2 + $0x8] sm:$0xff]  ;;  %v226_v53 = vld [vmem:[#allocation2 + $0x10] sm:$0xff]  ;;  %s2112_s2 = smov 16   ;;  %vm562_vm4 = vcmask 130048  }
  0x50   :  { %v145_v8 = vsub.s32 0, %v2249_v7  ;;  %v228_v62 = vld [vmem:[#allocation2 + $0x20] sm:$0xff]  ;;  %vm565_vm5 = vcmask 195584  }
  0x52   :  { %1609 = vmatpush3.bf16.msra.mxu0 %v1834_v2  ;;  %v146_v11 = vrot.slane %v2255_v9, %v145_v8  ;;  %v229_v2 = vld [vmem:[#allocation2 + $0x28] sm:$0xff] }
  0x55   :  { %1611 = vmatmul.mubr.msk.bf16.vlgmr.msra.gmra.mxu0 %vm159_vm1, %v138_v5 }
 0x115   :  { %v197_v10 = vpop.f32.mrf.mxu0 }
 0x116   :  { %v198_v14 = vadd.f32 %v197_v10, %v146_v11 }
 0x117   :  { %v1612_v12 = vpop.f32.mrf.mxu0 }
 0x118   :  { %v230_v12 = vld [vmem:[#allocation2 + $0x30] sm:$0xff] }
 0x119   :  { %v200_v13 = vpop.f32.mrf.mxu0 }
 0x11a   :  { %v201_v15 = vadd.f32 %v200_v13, %v146_v11  ;;  %v231_v13 = vld [vmem:[#allocation2 + $0x38] sm:$0xff] }
 0x11b   :  { %v1613_v16 = vpop.f32.mrf.mxu0 }
 0x11c   :  { %v1768_v17 = vpack.i.bf16 %v201_v15, %v198_v14  ;;  %v2260_v18 = vpack.c.bf16 %v201_v15, %v198_v14 }
 0x11e   :  { %1769 = vrot.lane.b32.xlu1 %v1768_v17, %s2107_s0  ;;  %1759 = vrot.lane.b32.xlu0 %v1768_v17, %s2108_s21 }
 0x11f   :  { %1622 = vmatprep.mubr.msk.bf16.mxu1 %vm248_vm2, %v2260_v18 }
 0x122   :  { %1764 = vrot.lane.b32.xlu0 %v1768_v17, %s2109_s10 }
 0x190   :  { %v1770_v19 = vpop.permute.xlu1 %1769  ;;  %v1760_v20 = vpop.permute.xlu0 %1759 }
 0x191   :  { %v1762_v21 = vunpack.i.h.bf16 %v1760_v20  ;;  %v1761_v22 = vunpack.i.l.bf16 %v1760_v20  ;;  %v1772_v23 = vunpack.i.h.bf16 %v1770_v19  ;;  %v1771_v24 = vunpack.i.l.bf16 %v1770_v19 }
 0x193   :  { %v2267_v25 = vpack.c.bf16 %v1762_v21, %v1761_v22  ;;  %v2271_v29 = vpack.c.bf16 %v1772_v23, %v1771_v24 }
 0x194   :  { %v1765_v26 = vpop.permute.xlu0 %1764 }
 0x195   :  { %v1767_v27 = vunpack.i.h.bf16 %v1765_v26  ;;  %v1766_v28 = vunpack.i.l.bf16 %v1765_v26  ;;  %246 = vrot.lane.b32.xlu1 %v2267_v25, %s2110_s22 }
 0x197   :  { %v2273_v30 = vpack.c.bf16 %v1767_v27, %v1766_v28 }
 0x199   :  { %244 = vrot.lane.b32.xlu0 %v2273_v30, %s2110_s22  ;;  %242 = vrot.lane.b32.xlu1 %v2271_v29, %s2110_s22 }
 0x19d   :  { %240 = vrot.lane.b32.xlu0 %v2260_v18, %s2110_s22 }
 0x207   :  { %v247_v31 = vpop.permute.xlu1 %246 }
 0x208   :  { %1730 = vmatprep.subr.msk.bf16.mxu1 %vm248_vm2, %v247_v31  ;;  %v271_v32 = vsel %vm248_vm2, %v247_v31, 0 }
 0x209   :  { %1615 = vmatpush3.bf16.xpose.msra.mxu1 %v271_v32 }
 0x20b   :  { %v245_v33 = vpop.permute.xlu0 %244  ;;  %v243_v35 = vpop.permute.xlu1 %242 }
 0x20c   :  { %1731 = vmatprep.subr.msk.bf16.mxu1 %vm248_vm2, %v245_v33  ;;  %v268_v34 = vsel %vm248_vm2, %v245_v33, 0  ;;  %v265_v36 = vsel %vm248_vm2, %v243_v35, 0 }
 0x20f   :  { %v241_v37 = vpop.permute.xlu0 %240 }
 0x210   :  { %v262_v38 = vsel %vm248_vm2, %v241_v37, 0 }
 0x211   :  { %1617 = vmatpush3.bf16.xpose.msra.mxu1 %v268_v34 }
 0x212   :  { %1732 = vmatprep.subr.msk.bf16.mxu1 %vm248_vm2, %v243_v35 }
 0x219   :  { %1619 = vmatpush3.bf16.xpose.msra.mxu1 %v265_v36 }
 0x21a   :  { %1733 = vmatprep.subr.msk.bf16.mxu1 %vm248_vm2, %v241_v37 }
 0x221   :  { %1621 = vmatpush3.bf16.xpose.msra.mxu1 %v262_v38 }
 0x222   :  { %1662 = vmatprep.subr.bf16.mxu1 %v2105_v0 }
 0x228   :  { %1623 = vmatmul.mubr.msk.bf16.vlgmr.msra.gmra.mxu1 %vm248_vm2, %v2271_v29 }
 0x229   :  { %1626 = vmatprep.mubr.msk.bf16.mxu1 %vm248_vm2, %v2273_v30 }
 0x230   :  { %1627 = vmatmul.mubr.msk.bf16.gmra.mxu1 %vm248_vm2, %v2267_v25 }
 0x231   :  { %1666 = vmatprep.mubr.msk.bf16.mxu1 %vm2106_vm0, %v2105_v0 }
 0x2e8   :  { %v1624_v39 = vpop.f32.mrf.mxu1 }
 0x2e9   :  { %v340_v47 = vmul.f32 0.35355338, %v1624_v39 }
 0x2ea   :  { %v307_v40 = vpop.f32.mrf.mxu1 }
 0x2eb   :  { %v338_v42 = vmul.f32 0.35355338, %v307_v40  ;;  %v348_v57 = vadd.f32 %v340_v47, %v226_v53 }
 0x2ec   :  { %v1625_v43 = vpop.f32.mrf.mxu1 }
 0x2ed   :  { %v341_v45 = vmul.f32 0.35355338, %v1625_v43  ;;  %v346_v46 = vadd.f32 %v338_v42, %v224_v41  ;;  %v361_v1 = vsel %vm354_vm3, %v348_v57, -inf }
 0x2ee   :  { %v310_v48 = vpop.f32.mrf.mxu1 }
 0x2ef   :  { %v339_v50 = vmul.f32 0.35355338, %v310_v48  ;;  %v355_v51 = vsel %vm354_vm3, %v346_v46, -inf  ;;  %v349_v52 = vadd.f32 %v341_v45, %v227_v44 }
 0x2f0   :  { %356 = vmax.xlane.f32.xlu1 %v355_v51  ;;  %v1628_v54 = vpop.f32.mrf.mxu1 }
 0x2f1   :  { %v347_v55 = vadd.f32 %v339_v50, %v225_v49  ;;  %v364_v59 = vsel %vm354_vm3, %v349_v52, -inf  ;;  %v344_v5 = vmul.f32 0.35355338, %v1628_v54 }
 0x2f2   :  { %v323_v56 = vpop.f32.mrf.mxu1 }
 0x2f3   :  { %v342_v58 = vmul.f32 0.35355338, %v323_v56  ;;  %v358_v60 = vsel %vm354_vm3, %v347_v55, -inf  ;;  %v352_v17 = vadd.f32 %v344_v5, %v230_v12 }
 0x2f4   :  { %365 = vmax.xlane.f32.xlu1 %v364_v59  ;;  %359 = vmax.xlane.f32.xlu0 %v358_v60  ;;  %v1629_v61 = vpop.f32.mrf.mxu1 }
 0x2f5   :  { %v345_v6 = vmul.f32 0.35355338, %v1629_v61  ;;  %v350_v11 = vadd.f32 %v342_v58, %v228_v62  ;;  %v373_v20 = vsel %vm354_vm3, %v352_v17, -inf }
 0x2f6   :  { %v326_v63 = vpop.f32.mrf.mxu1 }
 0x2f7   :  { %v343_v10 = vmul.f32 0.35355338, %v326_v63  ;;  %v367_v15 = vsel %vm354_vm3, %v350_v11, -inf  ;;  %v353_v19 = vadd.f32 %v345_v6, %v231_v13 }
 0x2f8   :  { %362 = vmax.xlane.f32.xlu0 %v361_v1 }
 0x2f9   :  { %v351_v14 = vadd.f32 %v343_v10, %v229_v2  ;;  %v376_v21 = vsel %vm354_vm3, %v353_v19, -inf }
 0x2fb   :  { %v370_v16 = vsel %vm354_vm3, %v351_v14, -inf }
 0x2fc   :  { %368 = vmax.xlane.f32.xlu0 %v367_v15  ;;  %371 = vmax.xlane.f32.xlu1 %v370_v16 }
 0x300   :  { %374 = vmax.xlane.f32.xlu0 %v373_v20  ;;  %377 = vmax.xlane.f32.xlu1 %v376_v21 }
 0x311   :  { %451 = vrot.lane.b32.xlu1 %v2273_v30, %s2100_s25 }
 0x316   :  { %453 = vrot.lane.b32.xlu0 %v2267_v25, %s2100_s25 }
 0x379   :  { %v357_v22 = vpop.xlane.xlu1 %356 }
 0x37a   :  { %v379_v28 = vsub.f32 %v346_v46, %v357_v22 }
 0x37c   :  { %v387_v35 = vmul.f32 1.442695, %v379_v28 }
 0x37d   :  { %v366_v23 = vpop.xlane.xlu1 %365  ;;  %v360_v24 = vpop.xlane.xlu0 %359 }
 0x37e   :  { %v382_v26 = vsub.f32 %v349_v52, %v366_v23  ;;  %v380_v27 = vsub.f32 %v347_v55, %v360_v24 }
 0x380   :  { %v393_v31 = vmul.f32 1.442695, %v382_v26  ;;  %v389_v32 = vmul.f32 1.442695, %v380_v27 }
 0x381   :  { %v363_v33 = vpop.xlane.xlu0 %362 }
 0x382   :  { %1847 = vpow2.f32 %v393_v31  ;;  %v381_v34 = vsub.f32 %v348_v57, %v363_v33 }
 0x383   :  { %1849 = vpow2.f32 %v389_v32 }
 0x384   :  { %v391_v36 = vmul.f32 1.442695, %v381_v34 }
 0x385   :  { %v369_v37 = vpop.xlane.xlu0 %368  ;;  %v372_v38 = vpop.xlane.xlu1 %371 }
 0x386   :  { %1851 = vpow2.f32 %v391_v36  ;;  %v383_v30 = vsub.f32 %v350_v11, %v369_v37  ;;  %v384_v25 = vsub.f32 %v351_v14, %v372_v38 }
 0x387   :  { %1853 = vpow2.f32 %v387_v35 }
 0x388   :  { %v395_v43 = vmul.f32 1.442695, %v383_v30  ;;  %v397_v46 = vmul.f32 1.442695, %v384_v25  ;;  %v1835_v30 = vld [vmem:[#allocation7 + $0x8] sm:$0xff]  }
 0x389   :  { %v375_v39 = vpop.xlane.xlu0 %374  ;;  %v378_v40 = vpop.xlane.xlu1 %377 }
 0x38a   :  { %v385_v41 = vsub.f32 %v352_v17, %v375_v39  ;;  %v386_v42 = vsub.f32 %v353_v19, %v378_v40 }
 0x38c   :  { %v399_v44 = vmul.f32 1.442695, %v385_v41  ;;  %v401_v45 = vmul.f32 1.442695, %v386_v42  ;;  %v1836_v42 = vld [vmem:[#allocation7] sm:$0xff]  }
 0x38d   :  { %v454_v47 = vpop.permute.xlu0 %453  ;;  %v452_v49 = vpop.permute.xlu1 %451 }
 0x38e   :  { %1855 = vpow2.f32 %v399_v44  ;;  %1630 = vmatprep.subr.bf16.mxu0 %v454_v47 }
 0x38f   :  { %v1848_v48 = vpop.eup %1847  ;;  %1857 = vpow2.f32 %v401_v45  ;;  %1631 = vmatpush3.bf16.msra.mxu0 %v454_v47 }
 0x390   :  { %1859 = vpow2.f32 %v395_v43  ;;  %1632 = vmatprep.subr.bf16.mxu0 %v452_v49  ;;  %v412_v50 = vsel %vm354_vm3, %v1848_v48, 0.0  ;;  %v1850_v51 = vpop.eup %1849 }
 0x391   :  { %1861 = vpow2.f32 %v397_v46  ;;  %413 = vadd.xlane.f32.xlu1 %v412_v50  ;;  %v406_v54 = vsel %vm354_vm3, %v1850_v51, 0.0 }
 0x393   :  { %v1852_v52 = vpop.eup %1851  ;;  %1633 = vmatpush3.bf16.msra.mxu0 %v452_v49 }
 0x394   :  { %v409_v53 = vsel %vm354_vm3, %v1852_v52, 0.0  ;;  %v1854_v55 = vpop.eup %1853 }
 0x395   :  { %410 = vadd.xlane.f32.xlu0 %v409_v53  ;;  %407 = vadd.xlane.f32.xlu1 %v406_v54  ;;  %v403_v56 = vsel %vm354_vm3, %v1854_v55, 0.0 }
 0x399   :  { %404 = vadd.xlane.f32.xlu0 %v403_v56 }
 0x39b   :  { %v1856_v57 = vpop.eup %1855 }
 0x39c   :  { %v1858_v58 = vpop.eup %1857  ;;  %v421_v59 = vsel %vm354_vm3, %v1856_v57, 0.0 }
 0x39d   :  { %v1860_v60 = vpop.eup %1859  ;;  %422 = vadd.xlane.f32.xlu0 %v421_v59  ;;  %v424_v61 = vsel %vm354_vm3, %v1858_v58, 0.0 }
 0x39e   :  { %v1862_v62 = vpop.eup %1861  ;;  %425 = vadd.xlane.f32.xlu1 %v424_v61  ;;  %v415_v63 = vsel %vm354_vm3, %v1860_v60, 0.0 }
 0x39f   :  { %v418_v1 = vsel %vm354_vm3, %v1862_v62, 0.0 }
 0x3a1   :  { %416 = vadd.xlane.f32.xlu0 %v415_v63 }
 0x3a2   :  { %419 = vadd.xlane.f32.xlu1 %v418_v1 }
 0x3b3   :  { %449 = vrot.lane.b32.xlu1 %v2271_v29, %s2100_s25 }
 0x3b7   :  { %447 = vrot.lane.b32.xlu0 %v2260_v18, %s2100_s25  ;;  %s2111_s25 = smov 24  }
 0x41a   :  { %v414_v2 = vpop.xlane.xlu1 %413 }
 0x41e   :  { %v411_v5 = vpop.xlane.xlu0 %410  ;;  %v408_v6 = vpop.xlane.xlu1 %407 }
 0x41f   :  { %1863 = vrcp.f32 %v408_v6 }
 0x420   :  { %1865 = vrcp.f32 %v411_v5  ;;  %v2346_v5 = vld [vmem:[%s2545_s12] sm:$0xff] }
 0x421   :  { %v576_v6 = vrot.slane %v2346_v5, %v145_v8  ;;  %v1838_v8 = vld [vmem:[#allocation8] sm:$0xff]  }
 0x422   :  { %v405_v10 = vpop.xlane.xlu0 %404 }
 0x423   :  { %1867 = vrcp.f32 %v405_v10 }
 0x424   :  { %1869 = vrcp.f32 %v414_v2 }
 0x426   :  { %v423_v11 = vpop.xlane.xlu0 %422 }
 0x427   :  { %v426_v12 = vpop.xlane.xlu1 %425  ;;  %1871 = vrcp.f32 %v423_v11 }
 0x428   :  { %1873 = vrcp.f32 %v426_v12 }
 0x42a   :  { %v417_v13 = vpop.xlane.xlu0 %416 }
 0x42b   :  { %1875 = vrcp.f32 %v417_v13  ;;  %v420_v14 = vpop.xlane.xlu1 %419 }
 0x42c   :  { %1877 = vrcp.f32 %v420_v14  ;;  %v1864_v29 = vpop.eup %1863 }
 0x42d   :  { %v1866_v15 = vpop.eup %1865  ;;  %v430_v21 = vmul.f32 %v1864_v29, %v1850_v51 }
 0x42e   :  { %v448_v19 = vpop.permute.xlu0 %447  ;;  %v432_v22 = vmul.f32 %v1866_v15, %v1852_v52 }
 0x42f   :  { %v450_v16 = vpop.permute.xlu1 %449 }
 0x430   :  { %v1868_v18 = vpop.eup %1867  ;;  %1634 = vmatprep.subr.bf16.mxu0 %v450_v16 }
 0x431   :  { %v1870_v17 = vpop.eup %1869  ;;  %1635 = vmatpush3.bf16.msra.mxu0 %v450_v16  ;;  %v428_v20 = vmul.f32 %v1868_v18, %v1854_v55 }
 0x432   :  { %1636 = vmatprep.subr.bf16.mxu0 %v448_v19  ;;  %v434_v24 = vmul.f32 %v1870_v17, %v1848_v48 }
 0x433   :  { %v443_v23 = vpack.c.bf16 %v430_v21, %v428_v20 }
 0x434   :  { %v1872_v26 = vpop.eup %1871  ;;  %v444_v27 = vpack.c.bf16 %v434_v24, %v432_v22 }
 0x435   :  { %1637 = vmatpush3.bf16.msra.mxu0 %v448_v19  ;;  %1638 = vmatprep.mubr.msk.bf16.mxu0 %vm354_vm3, %v443_v23  ;;  %v1874_v28 = vpop.eup %1873  ;;  %v440_v35 = vmul.f32 %v1872_v26, %v1856_v57  ;;  %v1837_v19 = vld [vmem:[#allocation8 + $0x8] sm:$0xff]  }
 0x436   :  { %1646 = vmatprep.subr.bf16.mxu0 %v2105_v0  ;;  %v442_v36 = vmul.f32 %v1874_v28, %v1858_v58 }
 0x438   :  { %v1876_v31 = vpop.eup %1875  ;;  %1639 = vmatmul.mubr.msk.bf16.vlgmr.msra.gmra.mxu0 %vm354_vm3, %v444_v27  ;;  %v446_v38 = vpack.c.bf16 %v442_v36, %v440_v35 }
 0x439   :  { %v1878_v32 = vpop.eup %1877  ;;  %v436_v33 = vmul.f32 %v1876_v31, %v1860_v60  ;;  %1647 = vmatpush3.bf16.msra.mxu0 %v1835_v30  ;;  %v133_v30 = vld [vmem:[%s2534_s1] sm:$0xff] }
 0x43a   :  { %v438_v34 = vmul.f32 %v1878_v32, %v1862_v62  ;;  %1648 = vmatprep.subr.bf16.mxu0 %v2105_v0  ;;  %v681_v32 = vsub.s32 1, %v2249_v7 }
 0x43c   :  { %v445_v37 = vpack.c.bf16 %v438_v34, %v436_v33  ;;  %v682_v33 = vrot.slane %v2255_v9, %v681_v32  ;;  %v664_v9 = vsub.s32 3, %v2249_v7 }
 0x43d   :  { %1649 = vmatpush3.bf16.msra.mxu0 %v1836_v42 }
 0x43e   :  { %1642 = vmatprep.mubr.msk.bf16.mxu0 %vm354_vm3, %v445_v37  ;;  %1654 = vmatprep.subr.bf16.mxu0 %v2105_v0 }
 0x440   :  { %1643 = vmatmul.mubr.msk.bf16.gmra.mxu0 %vm354_vm3, %v446_v38 }
 0x441   :  { %1650 = vmatprep.mubr.msk.bf16.mxu0 %vm2106_vm0, %v2105_v0 }
 0x4f8   :  { %v1640_v25 = vpop.f32.mrf.mxu0 }
 0x4fa   :  { %v505_v39 = vpop.f32.mrf.mxu0 }
 0x4fc   :  { %v1641_v40 = vpop.f32.mrf.mxu0 }
 0x4fd   :  { %v1773_v41 = vpack.i.bf16 %v1641_v40, %v1640_v25  ;;  %v134_v25 = vld [vmem:[%s2534_s1 + $0x8] sm:$0xff] }
 0x4fe   :  { %v508_v43 = vpop.f32.mrf.mxu0 }
 0x4ff   :  { %1774 = vrot.lane.b32.xlu1 %v1773_v41, %s2097_s17  ;;  %v739_v41 = vpack.c.bf16 %v134_v25, %v133_v30 }
 0x500   :  { %v1644_v44 = vpop.f32.mrf.mxu0 }
 0x502   :  { %v521_v45 = vpop.f32.mrf.mxu0 }
 0x504   :  { %v1645_v46 = vpop.f32.mrf.mxu0 }
 0x505   :  { %v1783_v47 = vpack.i.bf16 %v1645_v46, %v1644_v44  ;;  %v665_v44 = vrot.slane %v2346_v5, %v664_v9  ;;  %v834_v9 = vld [vmem:[#allocation5] sm:$0xff] }
 0x506   :  { %v524_v48 = vpop.f32.mrf.mxu0 }
 0x507   :  { %v1778_v49 = vpack.i.bf16 %v524_v48, %v521_v45  ;;  %1784 = vrot.lane.b32.xlu1 %v1783_v47, %s2111_s25  ;;  %v670_v45 = vsub.s32 4, %v2249_v7 }
 0x509   :  { %1779 = vrot.lane.b32.xlu0 %v1778_v49, %s2112_s2  ;;  %v671_v49 = vrot.slane %v2346_v5, %v670_v45 }
 0x571   :  { %v1775_v50 = vpop.permute.xlu1 %1774 }
 0x572   :  { %v1777_v51 = vunpack.i.h.bf16 %v1775_v50  ;;  %v1776_v52 = vunpack.i.l.bf16 %v1775_v50 }
 0x574   :  { %v560_v57 = vsel %vm248_vm2, %v505_v39, %v1776_v52  ;;  %v561_v58 = vsel %vm248_vm2, %v508_v43, %v1777_v51 }
 0x579   :  { %v1785_v53 = vpop.permute.xlu1 %1784 }
 0x57a   :  { %v1787_v59 = vunpack.i.h.bf16 %v1785_v53  ;;  %v1786_v60 = vunpack.i.l.bf16 %v1785_v53 }
 0x57b   :  { %v1780_v54 = vpop.permute.xlu0 %1779 }
 0x57c   :  { %v1782_v55 = vunpack.i.h.bf16 %v1780_v54  ;;  %v1781_v56 = vunpack.i.l.bf16 %v1780_v54 }
 0x57e   :  { %v564_v61 = vsel %vm562_vm4, %v561_v58, %v1782_v55  ;;  %v563_v62 = vsel %vm562_vm4, %v560_v57, %v1781_v56 }
 0x57f   :  { %v567_v63 = vsel %vm565_vm5, %v564_v61, %v1787_v59  ;;  %v566_v1 = vsel %vm565_vm5, %v563_v62, %v1786_v60 }
 0x580   :  { %v568_v2 = vpack.c.bf16 %v567_v63, %v566_v1 }
 0x582   :  { %1651 = vmatmul.mubr.msk.bf16.vlgmr.msra.gmra.mxu0 %vm159_vm1, %v568_v2 }
 0x583   :  { %1658 = vmatprep.mubr.msk.bf16.mxu0 %vm2106_vm0, %v2105_v0  ;;  %1655 = vmatpush3.bf16.msra.mxu0 %v1837_v19 }
 0x584   :  { %1656 = vmatprep.subr.bf16.mxu0 %v2105_v0 }
 0x587   :  { %1657 = vmatpush3.bf16.msra.mxu0 %v1838_v8 }
 0x642   :  { %v626_v10 = vpop.f32.mrf.mxu0 }
 0x643   :  { %v627_v11 = vadd.f32 %v626_v10, %v576_v6 }
 0x644   :  { %v1652_v12 = vpop.f32.mrf.mxu0 }
 0x645   :  { %v633_v13 = vadd.f32 %v627_v11, %v2238_v3 }
 0x646   :  { %v629_v14 = vpop.f32.mrf.mxu0 }
 0x647   :  { %v630_v29 = vadd.f32 %v629_v14, %v576_v6  ;;  %v635_v15 = vsel %vm159_vm1, %v633_v13, 0.0 }
 0x648   :  { %636 = vadd.xlane.f32.xlu0 %v635_v15  ;;  %v1653_v16 = vpop.f32.mrf.mxu0 }
 0x649   :  { %v634_v18 = vadd.f32 %v630_v29, %v2243_v4 }
 0x64b   :  { %v638_v17 = vsel %vm159_vm1, %v634_v18, 0.0 }
 0x64c   :  { %639 = vadd.xlane.f32.xlu1 %v638_v17 }
 0x65e   :  { %742 = vrot.lane.b32.xlu0 %v1837_v19, %s2110_s22 }
 0x662   :  { %747 = vrot.lane.b32.xlu0 %v682_v33, %s2110_s22 }
 0x6d1   :  { %v637_v3 = vpop.xlane.xlu0 %636 }
 0x6d2   :  { %v642_v20 = vmul.f32 0.03125, %v637_v3 }
 0x6d4   :  { %v644_v21 = vsub.f32 %v633_v13, %v642_v20 }
 0x6d5   :  { %v640_v22 = vpop.xlane.xlu1 %639  ;;  %v743_v23 = vpop.permute.xlu0 %742 }
 0x6d6   :  { %v643_v24 = vmul.f32 0.03125, %v640_v22  ;;  %v646_v26 = vmul.f32 %v644_v21, %v644_v21  ;;  %1663 = vmatpush3.bf16.msra.mxu1 %v743_v23 }
 0x6d7   :  { %1664 = vmatprep.subr.bf16.mxu1 %v2105_v0 }
 0x6d8   :  { %v645_v4 = vsub.f32 %v634_v18, %v643_v24  ;;  %v648_v27 = vsel %vm159_vm1, %v646_v26, 0.0 }
 0x6d9   :  { %649 = vadd.xlane.f32.xlu1 %v648_v27  ;;  %v748_v56 = vpop.permute.xlu0 %747 }
 0x6da   :  { %v647_v28 = vmul.f32 %v645_v4, %v645_v4 }
 0x6dc   :  { %v651_v31 = vsel %vm159_vm1, %v647_v28, 0.0 }
 0x6dd   :  { %652 = vadd.xlane.f32.xlu1 %v651_v31 }
 0x6ee   :  { %740 = vrot.lane.b32.xlu1 %v1838_v8, %s2110_s22 }
 0x762   :  { %v650_v34 = vpop.xlane.xlu1 %649 }
 0x763   :  { %v654_v35 = vmul.f32 0.03125, %v650_v34 }
 0x765   :  { %v656_v36 = vadd.f32 1e-05, %v654_v35 }
 0x766   :  { %v653_v37 = vpop.xlane.xlu1 %652 }
 0x767   :  { %1879 = vrsqrt.f32 %v656_v36  ;;  %v655_v38 = vmul.f32 0.03125, %v653_v37 }
 0x769   :  { %v657_v39 = vadd.f32 1e-05, %v655_v38 }
 0x76a   :  { %v741_v40 = vpop.permute.xlu1 %740 }
 0x76b   :  { %1881 = vrsqrt.f32 %v657_v39  ;;  %1665 = vmatpush3.bf16.msra.mxu1 %v741_v40 }
 0x76e   :  { %1667 = vmatmul.mubr.msk.bf16.vlgmr.msra.gmra.mxu1 %vm159_vm1, %v739_v41 }
 0x774   :  { %v1880_v42 = vpop.eup %1879 }
 0x775   :  { %v660_v43 = vmul.f32 %v1880_v42, %v644_v21 }
 0x777   :  { %v666_v48 = vmul.f32 %v665_v44, %v660_v43 }
 0x778   :  { %v1882_v46 = vpop.eup %1881 }
 0x779   :  { %v661_v47 = vmul.f32 %v1882_v46, %v645_v4  ;;  %v2377_v51 = vadd.f32 %v671_v49, %v666_v48 }
 0x77b   :  { %v667_v50 = vmul.f32 %v665_v44, %v661_v47  ;;  %v837_v44 = vld [vmem:[#allocation5 + $0x18] sm:$0xff] }
 0x77d   :  { %v2379_v52 = vadd.f32 %v671_v49, %v667_v50  ;;  %v835_v49 = vld [vmem:[#allocation5 + $0x8] sm:$0xff] }
 0x77f   :  { %v678_v53 = vpack.c.bf16 %v2379_v52, %v2377_v51 }
 0x781   :  { %1659 = vmatmul.mubr.msk.bf16.vlgmr.msra.gmra.mxu0 %vm159_vm1, %v678_v53 }
 0x82e   :  { %v787_v54 = vpop.f32.mrf.mxu1 }
 0x82f   :  { %v788_v58 = vadd.f32 %v787_v54, %v748_v56 }
 0x830   :  { %v1668_v55 = vpop.f32.mrf.mxu1 }
 0x831   :  { %v836_v55 = vld [vmem:[#allocation5 + $0x10] sm:$0xff] }
 0x832   :  { %v790_v57 = vpop.f32.mrf.mxu1 }
 0x833   :  { %v791_v59 = vadd.f32 %v790_v57, %v748_v56 }
 0x834   :  { %v1669_v60 = vpop.f32.mrf.mxu1 }
 0x835   :  { %v1788_v61 = vpack.i.bf16 %v791_v59, %v788_v58  ;;  %v2384_v62 = vpack.c.bf16 %v791_v59, %v788_v58 }
 0x837   :  { %1789 = vrot.lane.b32.xlu0 %v1788_v61, %s2108_s21  ;;  %1799 = vrot.lane.b32.xlu1 %v1788_v61, %s2107_s0  ;;  %v863_v28 = vsel %vm248_vm2, %v2384_v62, 0 }
 0x83b   :  { %1794 = vrot.lane.b32.xlu0 %v1788_v61, %s2109_s10 }
 0x841   :  { %v732_v63 = vpop.f32.mrf.mxu0 }
 0x842   :  { %v733_v6 = vadd.f32 %v732_v63, %v682_v33 }
 0x843   :  { %v1660_v1 = vpop.f32.mrf.mxu0 }
 0x845   :  { %v735_v2 = vpop.f32.mrf.mxu0 }
 0x846   :  { %v736_v10 = vadd.f32 %v735_v2, %v682_v33  ;;  %v838_v2 = vld [vmem:[#allocation5 + $0x20] sm:$0xff] }
 0x847   :  { %v1661_v11 = vpop.f32.mrf.mxu0 }
 0x848   :  { %v1808_v12 = vpack.i.bf16 %v736_v10, %v733_v6  ;;  %v842_v13 = vpack.c.bf16 %v736_v10, %v733_v6  ;;  %v839_v11 = vld [vmem:[#allocation5 + $0x28] sm:$0xff] }
 0x84a   :  { %1809 = vrot.lane.b32.xlu1 %v1808_v12, %s2109_s10  ;;  %1804 = vrot.lane.b32.xlu0 %v1808_v12, %s2107_s0 }
 0x84b   :  { %1678 = vmatprep.mubr.msk.bf16.mxu0 %vm248_vm2, %v842_v13 }
 0x84e   :  { %1814 = vrot.lane.b32.xlu0 %v1808_v12, %s2108_s21 }
 0x8a9   :  { %v1790_v14 = vpop.permute.xlu0 %1789  ;;  %v1800_v3 = vpop.permute.xlu1 %1799 }
 0x8aa   :  { %v1792_v29 = vunpack.i.h.bf16 %v1790_v14  ;;  %v1791_v15 = vunpack.i.l.bf16 %v1790_v14  ;;  %v1802_v21 = vunpack.i.h.bf16 %v1800_v3  ;;  %v1801_v22 = vunpack.i.l.bf16 %v1800_v3 }
 0x8ac   :  { %v2393_v16 = vpack.c.bf16 %v1792_v29, %v1791_v15  ;;  %v2403_v23 = vpack.c.bf16 %v1802_v21, %v1801_v22  ;;  %v840_v15 = vld [vmem:[#allocation5 + $0x30] sm:$0xff] }
 0x8ad   :  { %v1795_v18 = vpop.permute.xlu0 %1794 }
 0x8ae   :  { %v1797_v17 = vunpack.i.h.bf16 %v1795_v18  ;;  %v1796_v19 = vunpack.i.l.bf16 %v1795_v18  ;;  %1734 = vmatprep.subr.msk.bf16.mxu0 %vm248_vm2, %v2393_v16  ;;  %v872_v8 = vsel %vm248_vm2, %v2393_v16, 0  ;;  %v866_v26 = vsel %vm248_vm2, %v2403_v23, 0  ;;  %v841_v18 = vld [vmem:[#allocation5 + $0x38] sm:$0xff] }
 0x8af   :  { %1671 = vmatpush3.bf16.xpose.msra.mxu0 %v872_v8 }
 0x8b0   :  { %v2399_v20 = vpack.c.bf16 %v1797_v17, %v1796_v19 }
 0x8b2   :  { %1735 = vmatprep.subr.msk.bf16.mxu0 %vm248_vm2, %v2399_v20  ;;  %v869_v24 = vsel %vm248_vm2, %v2399_v20, 0 }
 0x8b7   :  { %1673 = vmatpush3.bf16.xpose.msra.mxu0 %v869_v24 }
 0x8b8   :  { %1736 = vmatprep.subr.msk.bf16.mxu0 %vm248_vm2, %v2403_v23 }
 0x8bc   :  { %v1805_v4 = vpop.permute.xlu0 %1804  ;;  %v1810_v27 = vpop.permute.xlu1 %1809 }
 0x8bd   :  { %v1807_v31 = vunpack.i.h.bf16 %v1805_v4  ;;  %v1806_v33 = vunpack.i.l.bf16 %v1805_v4  ;;  %v1812_v34 = vunpack.i.h.bf16 %v1810_v27  ;;  %v1811_v35 = vunpack.i.l.bf16 %v1810_v27 }
 0x8bf   :  { %1675 = vmatpush3.bf16.xpose.msra.mxu0 %v866_v26  ;;  %v843_v36 = vpack.c.bf16 %v1807_v31, %v1806_v33  ;;  %v844_v37 = vpack.c.bf16 %v1812_v34, %v1811_v35 }
 0x8c0   :  { %1737 = vmatprep.subr.msk.bf16.mxu0 %vm248_vm2, %v2384_v62  ;;  %v1815_v38 = vpop.permute.xlu0 %1814 }
 0x8c1   :  { %v1817_v30 = vunpack.i.h.bf16 %v1815_v38  ;;  %v1816_v25 = vunpack.i.l.bf16 %v1815_v38 }
 0x8c3   :  { %v845_v39 = vpack.c.bf16 %v1817_v30, %v1816_v25 }
 0x8c7   :  { %1677 = vmatpush3.bf16.xpose.msra.mxu0 %v863_v28 }
 0x8c8   :  { %1718 = vmatprep.subr.bf16.mxu0 %v2105_v0 }
 0x8ce   :  { %1679 = vmatmul.mubr.msk.bf16.vlgmr.msra.gmra.mxu0 %vm248_vm2, %v843_v36 }
 0x8cf   :  { %1682 = vmatprep.mubr.msk.bf16.mxu0 %vm248_vm2, %v844_v37 }
 0x8d6   :  { %1683 = vmatmul.mubr.msk.bf16.gmra.mxu0 %vm248_vm2, %v845_v39 }
 0x8d7   :  { %1726 = vmatprep.mubr.msk.bf16.mxu0 %vm2106_vm0, %v2105_v0 }
 0x98e   :  { %v1680_v40 = vpop.f32.mrf.mxu0 }
 0x98f   :  { %v941_v47 = vmul.f32 0.35355338, %v1680_v40 }
 0x990   :  { %v908_v41 = vpop.f32.mrf.mxu0 }
 0x991   :  { %v939_v42 = vmul.f32 0.35355338, %v908_v41  ;;  %v949_v59 = vadd.f32 %v941_v47, %v836_v55 }
 0x992   :  { %v1681_v43 = vpop.f32.mrf.mxu0 }
 0x993   :  { %v942_v45 = vmul.f32 0.35355338, %v1681_v43  ;;  %v947_v46 = vadd.f32 %v939_v42, %v834_v9  ;;  %v961_v10 = vsel %vm354_vm3, %v949_v59, -inf }
 0x994   :  { %v911_v48 = vpop.f32.mrf.mxu0 }
 0x995   :  { %v940_v50 = vmul.f32 0.35355338, %v911_v48  ;;  %v955_v53 = vsel %vm354_vm3, %v947_v46, -inf  ;;  %v950_v54 = vadd.f32 %v942_v45, %v837_v44 }
 0x996   :  { %956 = vmax.xlane.f32.xlu1 %v955_v53  ;;  %v1684_v56 = vpop.f32.mrf.mxu0 }
 0x997   :  { %v948_v57 = vadd.f32 %v940_v50, %v835_v49  ;;  %v964_v61 = vsel %vm354_vm3, %v950_v54, -inf  ;;  %v945_v12 = vmul.f32 0.35355338, %v1684_v56 }
 0x998   :  { %v924_v58 = vpop.f32.mrf.mxu0 }
 0x999   :  { %v943_v60 = vmul.f32 0.35355338, %v924_v58  ;;  %v958_v63 = vsel %vm354_vm3, %v948_v57, -inf  ;;  %v953_v3 = vadd.f32 %v945_v12, %v840_v15 }
 0x99a   :  { %965 = vmax.xlane.f32.xlu1 %v964_v61  ;;  %959 = vmax.xlane.f32.xlu0 %v958_v63  ;;  %v1685_v1 = vpop.f32.mrf.mxu0 }
 0x99b   :  { %v946_v13 = vmul.f32 0.35355338, %v1685_v1  ;;  %v951_v29 = vadd.f32 %v943_v60, %v838_v2  ;;  %v973_v22 = vsel %vm354_vm3, %v953_v3, -inf }
 0x99c   :  { %v927_v6 = vpop.f32.mrf.mxu0 }
 0x99d   :  { %v944_v14 = vmul.f32 0.35355338, %v927_v6  ;;  %v967_v19 = vsel %vm354_vm3, %v951_v29, -inf  ;;  %v954_v21 = vadd.f32 %v946_v13, %v841_v18 }
 0x99e   :  { %962 = vmax.xlane.f32.xlu0 %v961_v10 }
 0x99f   :  { %v952_v17 = vadd.f32 %v944_v14, %v839_v11  ;;  %v976_v24 = vsel %vm354_vm3, %v954_v21, -inf }
 0x9a1   :  { %v970_v8 = vsel %vm354_vm3, %v952_v17, -inf }
 0x9a2   :  { %968 = vmax.xlane.f32.xlu0 %v967_v19  ;;  %971 = vmax.xlane.f32.xlu1 %v970_v8 }
 0x9a6   :  { %974 = vmax.xlane.f32.xlu0 %v973_v22  ;;  %977 = vmax.xlane.f32.xlu1 %v976_v24 }
 0x9b7   :  { %1055 = vrot.lane.b32.xlu1 %v2399_v20, %s2110_s22 }
 0x9bc   :  { %1057 = vrot.lane.b32.xlu0 %v2393_v16, %s2110_s22 }
 0xa1f   :  { %v957_v26 = vpop.xlane.xlu1 %956 }
 0xa20   :  { %v979_v33 = vsub.f32 %v947_v46, %v957_v26 }
 0xa22   :  { %v987_v38 = vmul.f32 1.442695, %v979_v33 }
 0xa23   :  { %v966_v4 = vpop.xlane.xlu1 %965  ;;  %v960_v27 = vpop.xlane.xlu0 %959 }
 0xa24   :  { %v982_v28 = vsub.f32 %v950_v54, %v966_v4  ;;  %v980_v31 = vsub.f32 %v948_v57, %v960_v27 }
 0xa26   :  { %v993_v34 = vmul.f32 1.442695, %v982_v28  ;;  %v989_v35 = vmul.f32 1.442695, %v980_v31 }
 0xa27   :  { %v963_v36 = vpop.xlane.xlu0 %962 }
 0xa28   :  { %1883 = vpow2.f32 %v993_v34  ;;  %v981_v37 = vsub.f32 %v949_v59, %v963_v36 }
 0xa29   :  { %1885 = vpow2.f32 %v989_v35 }
 0xa2a   :  { %v991_v30 = vmul.f32 1.442695, %v981_v37 }
 0xa2b   :  { %v969_v25 = vpop.xlane.xlu0 %968  ;;  %v972_v39 = vpop.xlane.xlu1 %971 }
 0xa2c   :  { %1887 = vpow2.f32 %v991_v30  ;;  %v983_v20 = vsub.f32 %v951_v29, %v969_v25  ;;  %v984_v16 = vsub.f32 %v952_v17, %v972_v39 }
 0xa2d   :  { %1889 = vpow2.f32 %v987_v38 }
 0xa2e   :  { %v995_v43 = vmul.f32 1.442695, %v983_v20  ;;  %v997_v46 = vmul.f32 1.442695, %v984_v16  ;;  %v1839_v20 = vld [vmem:[#allocation10 + $0x8] sm:$0xff]  }
 0xa2f   :  { %v975_v40 = vpop.xlane.xlu0 %974  ;;  %v978_v41 = vpop.xlane.xlu1 %977 }
 0xa30   :  { %v985_v9 = vsub.f32 %v953_v3, %v975_v40  ;;  %v986_v42 = vsub.f32 %v954_v21, %v978_v41 }
 0xa32   :  { %v999_v44 = vmul.f32 1.442695, %v985_v9  ;;  %v1001_v45 = vmul.f32 1.442695, %v986_v42  ;;  %v1840_v42 = vld [vmem:[#allocation10] sm:$0xff]  }
 0xa33   :  { %v1058_v47 = vpop.permute.xlu0 %1057  ;;  %v1056_v49 = vpop.permute.xlu1 %1055 }
 0xa34   :  { %1891 = vpow2.f32 %v999_v44  ;;  %1686 = vmatprep.subr.bf16.mxu1 %v1058_v47 }
 0xa35   :  { %v1884_v48 = vpop.eup %1883  ;;  %1893 = vpow2.f32 %v1001_v45  ;;  %1687 = vmatpush3.bf16.msra.mxu1 %v1058_v47 }
 0xa36   :  { %1895 = vpow2.f32 %v995_v43  ;;  %1688 = vmatprep.subr.bf16.mxu1 %v1056_v49  ;;  %v1012_v50 = vsel %vm354_vm3, %v1884_v48, 0.0  ;;  %v1886_v53 = vpop.eup %1885 }
 0xa37   :  { %1897 = vpow2.f32 %v997_v46  ;;  %1013 = vadd.xlane.f32.xlu1 %v1012_v50  ;;  %v1006_v56 = vsel %vm354_vm3, %v1886_v53, 0.0 }
 0xa39   :  { %v1888_v54 = vpop.eup %1887  ;;  %1689 = vmatpush3.bf16.msra.mxu1 %v1056_v49 }
 0xa3a   :  { %v1009_v55 = vsel %vm354_vm3, %v1888_v54, 0.0  ;;  %v1890_v57 = vpop.eup %1889 }
 0xa3b   :  { %1010 = vadd.xlane.f32.xlu0 %v1009_v55  ;;  %1007 = vadd.xlane.f32.xlu1 %v1006_v56  ;;  %v1003_v58 = vsel %vm354_vm3, %v1890_v57, 0.0 }
 0xa3f   :  { %1004 = vadd.xlane.f32.xlu0 %v1003_v58 }
 0xa41   :  { %v1892_v59 = vpop.eup %1891 }
 0xa42   :  { %v1894_v60 = vpop.eup %1893  ;;  %v1021_v61 = vsel %vm354_vm3, %v1892_v59, 0.0 }
 0xa43   :  { %v1896_v63 = vpop.eup %1895  ;;  %1022 = vadd.xlane.f32.xlu0 %v1021_v61  ;;  %v1024_v1 = vsel %vm354_vm3, %v1894_v60, 0.0 }
 0xa44   :  { %v1898_v2 = vpop.eup %1897  ;;  %1025 = vadd.xlane.f32.xlu1 %v1024_v1  ;;  %v1015_v6 = vsel %vm354_vm3, %v1896_v63, 0.0 }
 0xa45   :  { %v1018_v10 = vsel %vm354_vm3, %v1898_v2, 0.0 }
 0xa47   :  { %1016 = vadd.xlane.f32.xlu0 %v1015_v6 }
 0xa48   :  { %1019 = vadd.xlane.f32.xlu1 %v1018_v10 }
 0xa59   :  { %1053 = vrot.lane.b32.xlu1 %v2403_v23, %s2110_s22 }
 0xa5d   :  { %1051 = vrot.lane.b32.xlu0 %v2384_v62, %s2110_s22 }
 0xac0   :  { %v1014_v11 = vpop.xlane.xlu1 %1013 }
 0xac1   :  { %1899 = vrcp.f32 %v1014_v11 }
 0xac4   :  { %v1011_v12 = vpop.xlane.xlu0 %1010  ;;  %v1008_v13 = vpop.xlane.xlu1 %1007 }
 0xac5   :  { %1901 = vrcp.f32 %v1011_v12  ;;  %v1178_v12 = vrot.slane %v2346_v5, %v681_v32 }
 0xac6   :  { %1903 = vrcp.f32 %v1008_v13 }
 0xac8   :  { %v1005_v14 = vpop.xlane.xlu0 %1004 }
 0xac9   :  { %1905 = vrcp.f32 %v1005_v14 }
 0xacc   :  { %v1023_v29 = vpop.xlane.xlu0 %1022 }
 0xacd   :  { %1907 = vrcp.f32 %v1023_v29  ;;  %v1026_v15 = vpop.xlane.xlu1 %1025 }
 0xace   :  { %v1900_v18 = vpop.eup %1899  ;;  %1909 = vrcp.f32 %v1026_v15 }
 0xacf   :  { %v1034_v17 = vmul.f32 %v1900_v18, %v1884_v48 }
 0xad0   :  { %v1017_v19 = vpop.xlane.xlu0 %1016 }
 0xad1   :  { %1911 = vrcp.f32 %v1017_v19  ;;  %v1020_v23 = vpop.xlane.xlu1 %1019  ;;  %1278 = vst.msk [vmem:[#allocation14 + $0x18] sm:$0xff] %vm354_vm3, %v1034_v17 }
 0xad2   :  { %v1902_v62 = vpop.eup %1901  ;;  %1913 = vrcp.f32 %v1020_v23 }
 0xad3   :  { %v1904_v8 = vpop.eup %1903  ;;  %v1032_v3 = vmul.f32 %v1902_v62, %v1888_v54 }
 0xad4   :  { %v1030_v21 = vmul.f32 %v1904_v8, %v1886_v53  ;;  %v1052_v26 = vpop.permute.xlu0 %1051 }
 0xad5   :  { %v1054_v22 = vpop.permute.xlu1 %1053  ;;  %1277 = vst.msk [vmem:[#allocation14 + $0x10] sm:$0xff] %vm354_vm3, %v1032_v3  ;;  %v1044_v34 = vpack.c.bf16 %v1034_v17, %v1032_v3 }
 0xad6   :  { %v1906_v24 = vpop.eup %1905  ;;  %1690 = vmatprep.subr.bf16.mxu1 %v1054_v22  ;;  %1276 = vst.msk [vmem:[#allocation14 + $0x8] sm:$0xff] %vm354_vm3, %v1030_v21 }
 0xad7   :  { %1691 = vmatpush3.bf16.msra.mxu1 %v1054_v22  ;;  %v1028_v4 = vmul.f32 %v1906_v24, %v1890_v57 }
 0xad8   :  { %1692 = vmatprep.subr.bf16.mxu1 %v1052_v26 }
 0xad9   :  { %v1043_v27 = vpack.c.bf16 %v1030_v21, %v1028_v4  ;;  %1275 = vst.msk [vmem:[#allocation14] sm:$0xff] %vm354_vm3, %v1028_v4 }
 0xada   :  { %v1908_v28 = vpop.eup %1907 }
 0xadb   :  { %v1910_v31 = vpop.eup %1909  ;;  %1693 = vmatpush3.bf16.msra.mxu1 %v1052_v26  ;;  %1694 = vmatprep.mubr.msk.bf16.mxu1 %vm354_vm3, %v1043_v27  ;;  %v1040_v33 = vmul.f32 %v1908_v28, %v1892_v59 }
 0xadc   :  { %v1042_v35 = vmul.f32 %v1910_v31, %v1894_v60  ;;  %1702 = vmatprep.subr.bf16.mxu1 %v2105_v0  ;;  %v1841_v31 = vld [vmem:[#allocation11 + $0x8] sm:$0xff]  }
 0xadd   :  { %1281 = vst.msk [vmem:[#allocation14 + $0x30] sm:$0xff] %vm354_vm3, %v1040_v33 }
 0xade   :  { %v1912_v36 = vpop.eup %1911  ;;  %1695 = vmatmul.mubr.msk.bf16.vlgmr.msra.gmra.mxu1 %vm354_vm3, %v1044_v34  ;;  %1282 = vst.msk [vmem:[#allocation14 + $0x38] sm:$0xff] %vm354_vm3, %v1042_v35  ;;  %v1046_v39 = vpack.c.bf16 %v1042_v35, %v1040_v33  ;;  %v1843_v33 = vld [vmem:[%s2542_s9 + $0x18] sm:$0xff]  }
 0xadf   :  { %v1914_v37 = vpop.eup %1913  ;;  %v1036_v38 = vmul.f32 %v1912_v36, %v1896_v63  ;;  %1703 = vmatpush3.bf16.msra.mxu1 %v1839_v20  ;;  %1719 = vmatpush3.bf16.msra.mxu0 %v1843_v33 }
 0xae0   :  { %v1038_v30 = vmul.f32 %v1914_v37, %v1898_v2  ;;  %1704 = vmatprep.subr.bf16.mxu1 %v2105_v0  ;;  %1720 = vmatprep.subr.bf16.mxu0 %v2105_v0 }
 0xae1   :  { %1279 = vst.msk [vmem:[#allocation14 + $0x20] sm:$0xff] %vm354_vm3, %v1036_v38 }
 0xae2   :  { %v1045_v25 = vpack.c.bf16 %v1038_v30, %v1036_v38  ;;  %1280 = vst.msk [vmem:[#allocation14 + $0x28] sm:$0xff] %vm354_vm3, %v1038_v30 }
 0xae3   :  { %1705 = vmatpush3.bf16.msra.mxu1 %v1840_v42 }
 0xae4   :  { %1698 = vmatprep.mubr.msk.bf16.mxu1 %vm354_vm3, %v1045_v25  ;;  %1710 = vmatprep.subr.bf16.mxu1 %v2105_v0  ;;  %v1265_v25 = vsub.s32 5, %v2249_v7 }
 0xae6   :  { %1699 = vmatmul.mubr.msk.bf16.gmra.mxu1 %vm354_vm3, %v1046_v39 }
 0xae7   :  { %1706 = vmatprep.mubr.msk.bf16.mxu1 %vm2106_vm0, %v2105_v0 }
 0xb9e   :  { %v1696_v16 = vpop.f32.mrf.mxu1 }
 0xba0   :  { %v1109_v40 = vpop.f32.mrf.mxu1 }
 0xba2   :  { %v1697_v41 = vpop.f32.mrf.mxu1 }
 0xba3   :  { %v1818_v9 = vpack.i.bf16 %v1697_v41, %v1696_v16  ;;  %v1266_v16 = vrot.slane %v2346_v5, %v1265_v25 }
 0xba4   :  { %v1112_v43 = vpop.f32.mrf.mxu1 }
 0xba5   :  { %1819 = vrot.lane.b32.xlu1 %v1818_v9, %s2097_s17 }
 0xba6   :  { %v1700_v44 = vpop.f32.mrf.mxu1 }
 0xba8   :  { %v1125_v45 = vpop.f32.mrf.mxu1 }
 0xbaa   :  { %v1701_v46 = vpop.f32.mrf.mxu1 }
 0xbab   :  { %v1828_v47 = vpack.i.bf16 %v1701_v46, %v1700_v44 }
 0xbac   :  { %v1128_v48 = vpop.f32.mrf.mxu1 }
 0xbad   :  { %v1823_v49 = vpack.i.bf16 %v1128_v48, %v1125_v45  ;;  %1829 = vrot.lane.b32.xlu1 %v1828_v47, %s2111_s25  ;;  %v1844_v48 = vld [vmem:[%s2542_s9 + $0x10] sm:$0xff]  }
 0xbae   :  { %1721 = vmatpush3.bf16.msra.mxu0 %v1844_v48 }
 0xbaf   :  { %1824 = vrot.lane.b32.xlu0 %v1823_v49, %s2112_s2  ;;  %1722 = vmatprep.subr.bf16.mxu0 %v2105_v0  ;;  %v1845_v49 = vld [vmem:[%s2542_s9 + $0x8] sm:$0xff]  }
 0xbb2   :  { %1723 = vmatpush3.bf16.msra.mxu0 %v1845_v49 }
 0xbb3   :  { %1724 = vmatprep.subr.bf16.mxu0 %v2105_v0 }
 0xc17   :  { %v1820_v50 = vpop.permute.xlu1 %1819 }
 0xc18   :  { %v1822_v53 = vunpack.i.h.bf16 %v1820_v50  ;;  %v1821_v54 = vunpack.i.l.bf16 %v1820_v50  ;;  %v1846_v50 = vld [vmem:[%s2542_s9] sm:$0xff]   ;;  %s2113_s9 = smov [#allocation14]  }
 0xc19   :  { %1725 = vmatpush3.bf16.msra.mxu0 %v1846_v50 }
 0xc1a   :  { %v1164_v59 = vsel %vm248_vm2, %v1109_v40, %v1821_v54  ;;  %v1165_v60 = vsel %vm248_vm2, %v1112_v43, %v1822_v53  ;;  %v1271_v40 = vsub.s32 6, %v2249_v7  ;;  %v1541_v53 = vld [vmem:[%s2544_s11] ss:$0 sm:$0xff]  ;;  %s1493_s11 = sshll.u32 %s2113_s9, 4  ;;  %s1494_s11 = int_to_ptr.vmem [resolvable:$true] %s1493_s11 }
 0xc1b   :  { %s2043_s4 = scalar_lea.vmem %s1494_s11, 1024  ;;  %p2048_p3 = scmp.lt.s32.totalorder %s1494_s11, %s1494_s11 }
 0xc1c   :  { %v1272_v43 = vrot.slane %v2346_v5, %v1271_v40  ;;  %p2044_p2 = scmp.ne.s32.totalorder %s1494_s11, %s2043_s4  ;;  %p2049_p4 = scmp.lt.s32.totalorder %s2043_s4, %s2043_s4 }
 0xc1e   :  { %p2050_p5 = por %p2049_p4, %p2048_p3 }
 0xc1f   :  { %v1830_v55 = vpop.permute.xlu1 %1829 }
 0xc20   :  { %v1832_v61 = vunpack.i.h.bf16 %v1830_v55  ;;  %v1831_v63 = vunpack.i.l.bf16 %v1830_v55  ;;  %p2051_p6 = pnand %p2050_p5, %p2044_p2 }
 0xc21   :  { %v1825_v56 = vpop.permute.xlu0 %1824 }
 0xc22   :  { %v1827_v57 = vunpack.i.h.bf16 %v1825_v56  ;;  %v1826_v58 = vunpack.i.l.bf16 %v1825_v56 }
 0xc24   :  { %v1167_v1 = vsel %vm562_vm4, %v1165_v60, %v1827_v57  ;;  %v1166_v2 = vsel %vm562_vm4, %v1164_v59, %v1826_v58 }
 0xc25   :  { %v1169_v6 = vsel %vm565_vm5, %v1167_v1, %v1832_v61  ;;  %v1168_v10 = vsel %vm565_vm5, %v1166_v2, %v1831_v63 }
 0xc26   :  { %v1170_v11 = vpack.c.bf16 %v1169_v6, %v1168_v10 }
 0xc28   :  { %1707 = vmatmul.mubr.msk.bf16.vlgmr.msra.gmra.mxu1 %vm159_vm1, %v1170_v11 }
 0xc29   :  { %1714 = vmatprep.mubr.msk.bf16.mxu1 %vm2106_vm0, %v2105_v0  ;;  %1711 = vmatpush3.bf16.msra.mxu1 %v1841_v31 }
 0xc2a   :  { %1712 = vmatprep.subr.bf16.mxu1 %v2105_v0  ;;  %v1364_v0 = vsub.s32 2, %v2249_v7 }
 0xc2c   :  { %v1365_v1 = vrot.slane %v2346_v5, %v1364_v0 }
 0xce8   :  { %v1228_v13 = vpop.f32.mrf.mxu1 }
 0xce9   :  { %v1229_v14 = vadd.f32 %v1228_v13, %v1178_v12 }
 0xcea   :  { %v1708_v29 = vpop.f32.mrf.mxu1 }
 0xceb   :  { %v1235_v15 = vadd.f32 %v1229_v14, %v2377_v51 }
 0xcec   :  { %v1231_v18 = vpop.f32.mrf.mxu1 }
 0xced   :  { %v1232_v17 = vadd.f32 %v1231_v18, %v1178_v12  ;;  %v1237_v19 = vsel %vm159_vm1, %v1235_v15, 0.0 }
 0xcee   :  { %1238 = vadd.xlane.f32.xlu0 %v1237_v19  ;;  %v1709_v23 = vpop.f32.mrf.mxu1 }
 0xcef   :  { %v1236_v62 = vadd.f32 %v1232_v17, %v2379_v52  ;;  %v1842_v52 = vld [vmem:[#allocation11] sm:$0xff]  }
 0xcf0   :  { %1713 = vmatpush3.bf16.msra.mxu1 %v1842_v52 }
 0xcf1   :  { %v1240_v8 = vsel %vm159_vm1, %v1236_v62, 0.0 }
 0xcf2   :  { %1241 = vadd.xlane.f32.xlu1 %v1240_v8 }
 0xd77   :  { %v1239_v3 = vpop.xlane.xlu0 %1238 }
 0xd78   :  { %v1243_v21 = vmul.f32 0.03125, %v1239_v3 }
 0xd7a   :  { %v1245_v22 = vsub.f32 %v1235_v15, %v1243_v21 }
 0xd7b   :  { %v1242_v32 = vpop.xlane.xlu1 %1241 }
 0xd7c   :  { %v1244_v24 = vmul.f32 0.03125, %v1242_v32  ;;  %v1247_v26 = vmul.f32 %v1245_v22, %v1245_v22 }
 0xd7e   :  { %v1246_v4 = vsub.f32 %v1236_v62, %v1244_v24  ;;  %v1249_v51 = vsel %vm159_vm1, %v1247_v26, 0.0 }
 0xd7f   :  { %1250 = vadd.xlane.f32.xlu0 %v1249_v51 }
 0xd80   :  { %v1248_v27 = vmul.f32 %v1246_v4, %v1246_v4 }
 0xd82   :  { %v1252_v28 = vsel %vm159_vm1, %v1248_v27, 0.0 }
 0xd83   :  { %1253 = vadd.xlane.f32.xlu0 %v1252_v28 }
 0xe08   :  { %v1251_v34 = vpop.xlane.xlu0 %1250 }
 0xe09   :  { %v1255_v35 = vmul.f32 0.03125, %v1251_v34 }
 0xe0b   :  { %v1257_v36 = vadd.f32 1e-05, %v1255_v35 }
 0xe0c   :  { %v1254_v37 = vpop.xlane.xlu0 %1253 }
 0xe0d   :  { %1915 = vrsqrt.f32 %v1257_v36  ;;  %v1256_v38 = vmul.f32 0.03125, %v1254_v37 }
 0xe0f   :  { %v1258_v30 = vadd.f32 1e-05, %v1256_v38 }
 0xe11   :  { %1917 = vrsqrt.f32 %v1258_v30 }
 0xe1a   :  { %v1916_v39 = vpop.eup %1915 }
 0xe1b   :  { %v1261_v20 = vmul.f32 %v1916_v39, %v1245_v22 }
 0xe1d   :  { %v1267_v42 = vmul.f32 %v1266_v16, %v1261_v20 }
 0xe1e   :  { %v1918_v41 = vpop.eup %1917 }
 0xe1f   :  { %v1262_v9 = vmul.f32 %v1918_v41, %v1246_v4  ;;  %v1273_v45 = vadd.f32 %v1272_v43, %v1267_v42 }
 0xe21   :  { %v1268_v44 = vmul.f32 %v1266_v16, %v1262_v9 }
 0xe23   :  { %v1274_v46 = vadd.f32 %v1272_v43, %v1268_v44 }
 0xe25   :  { %v1283_v47 = vpack.c.bf16 %v1274_v46, %v1273_v45 }
 0xe27   :  { %1715 = vmatmul.mubr.msk.bf16.vlgmr.msra.gmra.mxu1 %vm159_vm1, %v1283_v47 }
 0xee7   :  { %v1344_v54 = vpop.f32.mrf.mxu1 }
 0xee8   :  { %v1345_v56 = vadd.f32 %v1541_v53, %v1344_v54 }
 0xee9   :  { %v1716_v55 = vpop.f32.mrf.mxu1 }
 0xeea   :  { %v1351_v60 = vmax.f32 %v1345_v56, 0.0 }
 0xeeb   :  { %v1347_v57 = vpop.f32.mrf.mxu1 }
 0xeec   :  { %v1348_v58 = vadd.f32 %v1541_v53, %v1347_v57 }
 0xeed   :  { %v1717_v59 = vpop.f32.mrf.mxu1 }
 0xeee   :  { %v1352_v61 = vmax.f32 %v1348_v58, 0.0 }
 0xef0   :  { %v1353_v63 = vpack.c.bf16 %v1352_v61, %v1351_v60 }
 0xef2   :  { %1727 = vmatmul.mubr.msk.bf16.vlgmr.msra.gmra.mxu0 %vm354_vm3, %v1353_v63 }
 0xfb2   :  { %v1427_v2 = vpop.f32.mrf.mxu0 }
 0xfb3   :  { %v1428_v6 = vadd.f32 %v1427_v2, %v1365_v1 }
 0xfb4   :  { %v1728_v10 = vpop.f32.mrf.mxu0 }
 0xfb5   :  { %v1434_v11 = vadd.f32 %v1428_v6, %v1273_v45 }
 0xfb6   :  { %v1430_v12 = vpop.f32.mrf.mxu0 }
 0xfb7   :  { %v1431_v13 = vadd.f32 %v1430_v12, %v1365_v1  ;;  %v1436_v14 = vsel %vm159_vm1, %v1434_v11, 0.0 }
 0xfb8   :  { %1437 = vadd.xlane.f32.xlu1 %v1436_v14  ;;  %v1729_v29 = vpop.f32.mrf.mxu0 }
 0xfb9   :  { %v1435_v15 = vadd.f32 %v1431_v13, %v1274_v46 }
 0xfbb   :  { %v1439_v18 = vsel %vm159_vm1, %v1435_v15, 0.0 }
 0xfbc   :  { %1440 = vadd.xlane.f32.xlu0 %v1439_v18 }
0x1041   :  { %v1438_v17 = vpop.xlane.xlu1 %1437 }
0x1042   :  { %v1442_v19 = vmul.f32 0.03125, %v1438_v17 }
0x1044   :  { %v1444_v23 = vsub.f32 %v1434_v11, %v1442_v19 }
0x1045   :  { %v1441_v62 = vpop.xlane.xlu0 %1440 }
0x1046   :  { %v1443_v8 = vmul.f32 0.03125, %v1441_v62  ;;  %v1446_v3 = vmul.f32 %v1444_v23, %v1444_v23 }
0x1048   :  { %v1445_v21 = vsub.f32 %v1435_v15, %v1443_v8  ;;  %v1448_v22 = vsel %vm159_vm1, %v1446_v3, 0.0 }
0x1049   :  { %1449 = vadd.xlane.f32.xlu1 %v1448_v22 }
0x104a   :  { %v1447_v32 = vmul.f32 %v1445_v21, %v1445_v21 }
0x104c   :  { %v1451_v24 = vsel %vm159_vm1, %v1447_v32, 0.0 }
0x104d   :  { %1452 = vadd.xlane.f32.xlu0 %v1451_v24 }
0x104e   :  { %2054 = shalt.err (!%p2051_p6)
}
0x104f   :  { %1499 = dma.vmem_to_hbm [thread:$0]  %s1494_s11, 1024, %s2547_s14, [#allocation15], %s2096_s16, %s2096_s16, %s2097_s17   ;;  %v1464_v52 = vsub.s32 7, %v2249_v7 }
0x1050   :  { %v1550_v36 = vld [vmem:[%s2545_s12 + $0x8] ss:$0 sm:$0xff]  ;;  %s2114_s14 = smov [#allocation13]  }
0x1051   :  { %v1465_v33 = vrot.slane %v2346_v5, %v1464_v52  ;;  %s1481_s22 = sshll.u32 %s2114_s14, 4  ;;  %s1482_s22 = int_to_ptr.vmem [resolvable:$true] %s1481_s22 }
0x1052   :  { %s2063_s25 = scalar_lea.vmem %s1482_s22, 256  ;;  %p2068_p8 = scmp.lt.s32.totalorder %s1482_s22, %s1482_s22 }
0x1053   :  { %p2064_p7 = scmp.ne.s32.totalorder %s1482_s22, %s2063_s25  ;;  %p2069_p9 = scmp.lt.s32.totalorder %s2063_s25, %s2063_s25 }
0x1055   :  { %p2070_p10 = por %p2069_p9, %p2068_p8 }
0x1057   :  { %p2071_p11 = pnand %p2070_p10, %p2064_p7 }
0x10d2   :  { %v1450_v26 = vpop.xlane.xlu1 %1449 }
0x10d3   :  { %v1454_v4 = vmul.f32 0.03125, %v1450_v26 }
0x10d5   :  { %v1456_v51 = vadd.f32 1e-05, %v1454_v4 }
0x10d6   :  { %v1453_v27 = vpop.xlane.xlu0 %1452 }
0x10d7   :  { %1919 = vrsqrt.f32 %v1456_v51  ;;  %v1455_v28 = vmul.f32 0.03125, %v1453_v27 }
0x10d9   :  { %v1457_v31 = vadd.f32 1e-05, %v1455_v28 }
0x10db   :  { %1921 = vrsqrt.f32 %v1457_v31 }
0x10e4   :  { %v1920_v34 = vpop.eup %1919 }
0x10e5   :  { %v1460_v35 = vmul.f32 %v1920_v34, %v1444_v23 }
0x10e7   :  { %v1466_v37 = vmul.f32 %v1465_v33, %v1460_v35 }
0x10e8   :  { %v1922_v38 = vpop.eup %1921 }
0x10e9   :  { %v1461_v30 = vmul.f32 %v1922_v38, %v1445_v21  ;;  %v1472_v25 = vadd.f32 %v1550_v36, %v1466_v37 }
0x10eb   :  { %v1467_v39 = vmul.f32 %v1465_v33, %v1461_v30  ;;  %1474 = vst.msk [vmem:[#allocation13] sm:$0xff] %vm159_vm1, %v1472_v25 }
0x10ed   :  { %v1473_v20 = vadd.f32 %v1550_v36, %v1467_v39 }
0x10ef   :  { %1475 = vst.msk [vmem:[#allocation13 + $0x8] sm:$0xff] %vm159_vm1, %v1473_v20 }
0x10f0   :  { %2074 = shalt.err (!%p2071_p11)
}
0x10f1   :  { %1487 = dma.vmem_to_hbm [thread:$0]  %s1482_s22, 256, %s2546_s13, [#allocation4], %s2096_s16, %s2096_s16, %s2097_s17  }
0x10f2   :  { %2091 = dma.done.wait [#allocation4], 256  }
0x10f3   :  { %2092 = vsyncadd [#allocation4], 4294967040 }
0x10f4   :  { %2093 = dma.done.wait [#allocation15], 1024  }
0x10f5   :  { %2094 = vsyncadd [#allocation15], 4294966272 }
0x10f6   :  { %1506 = vsyncpa [#allocation3], 1 }
0x10f7   :  { %1507 = vsyncpa [#allocation6], 1 }
0x10f8   :  { %1508 = vsyncpa [#allocation9], 1 }
0x10f9   :  { %1509 = vsyncpa [#allocation12], 1 }
0x10fa   :  { %1510 = vsyncpa [#allocation4], 1 }
0x10fb   :  { %1511 = vsyncpa [#allocation15], 1 }

</bundles_post_ra>
